<compile_context>
chip_gen: v7x
topology: tpu7x:2x2x1
jax: 0.10.0
libtpu: 0.0.40
codegen_flags: <defaults>
</compile_context>

<pallas_src>
import jax
import jax.numpy as jnp
from jax.experimental import pallas as pl
from jax.experimental.pallas import tpu as pltpu

WEIGHT_DTYPE = jnp.bfloat16   # MXU-input / DMA dtype; accumulation stays f32.


def _build_first_layer_block(conv_ws, lin_w, *, filter_sizes, seq_len, emb_dim,
                             n_filters, d_size, dtype):
    """Pack every conv window of every filter size plus lin_w^T into one block
    weight (seq_len*emb_dim, n_conv_cols + d_size) so the whole first layer is
    a single MXU matmul whose output columns share one 128-lane group."""
    K = seq_len * emb_dim
    n_conv_cols = sum((seq_len - fs + 1) * n_filters for fs in filter_sizes)
    W = jnp.zeros((K, n_conv_cols + d_size), jnp.float32)
    col = 0
    for i, fs in enumerate(filter_sizes):
        # PyTorch Conv1d weight (n_filters, emb, fs) -> window-major (fs*emb, n_filters)
        wm = jnp.transpose(conv_ws[i], (2, 1, 0)).reshape(fs * emb_dim, n_filters)
        for t in range(seq_len - fs + 1):
            # Window x_seq[:, t:t+fs, :] is the contiguous flat-row slice
            # features[:, t*emb:(t+fs)*emb]  ->  rows t*emb:(t+fs)*emb of W.
            W = W.at[t * emb_dim:(t + fs) * emb_dim, col:col + n_filters].set(wm)
            col += n_filters
    W = W.at[:, col:col + d_size].set(lin_w.T)     # parallel linear branch
    return W.astype(dtype)


def _make_kernel(filter_sizes, emb_dim, n_filters, d_size):
    nfs = len(filter_sizes)
    seq_len = nfs     # features.reshape(B, -1, 768) -> L == args.filter_size

    def kernel(*refs):
        (feat_ref, w1_ref, convb_ref, linb_ref) = refs[0:4]
        fcw_refs = refs[4:4 + nfs]
        (fcb_ref, dwt_ref, dwb_ref, db_ref, pw_ref, pb_ref) = refs[4 + nfs:4 + nfs + 6]
        out_ref = refs[-1]

        # --- First layer: ALL conv windows + lin branch as ONE bf16 MXU matmul.
        y = jnp.dot(feat_ref[...], w1_ref[...],
                    preferred_element_type=jnp.float32)            # (B, C1) f32

        # --- Per conv branch: max over windows, then shared bias + ReLU
        #     (relu(max(z)) == max(relu(z)); max(z_t + b) == max(z_t) + b).
        col = 0
        pooled = []
        for i, fs in enumerate(filter_sizes):
            n_win = seq_len - fs + 1
            m = y[:, col:col + n_filters]
            for t in range(1, n_win):
                m = jnp.maximum(m, y[:, col + t * n_filters:col + (t + 1) * n_filters])
            col += n_win * n_filters
            b = convb_ref[:, i * n_filters:(i + 1) * n_filters]    # f32
            pooled.append(jnp.maximum(m + b, 0.0).astype(WEIGHT_DTYPE))

        # --- Parallel linear branch (last d_size columns of the fused matmul).
        feat_lin = y[:, col:col + d_size] + linb_ref[...]          # (B, d_size) f32

        # --- TextCNN fc: concat(pooled) @ fc_w  ==  sum of per-branch partials.
        cnn_out = fcb_ref[...]                                     # (1, d_size) f32
        for i in range(nfs):
            cnn_out = cnn_out + jnp.dot(pooled[i], fcw_refs[i][...],
                                        preferred_element_type=jnp.float32)

        # --- dense(cat(cnn_out, feat_lin)) + tanh; concat folded into split weights.
        pre = (jnp.dot(cnn_out.astype(WEIGHT_DTYPE), dwt_ref[...],
                       preferred_element_type=jnp.float32)
               + jnp.dot(feat_lin.astype(WEIGHT_DTYPE), dwb_ref[...],
                         preferred_element_type=jnp.float32)
               + db_ref[...])
        h = jnp.tanh(pre)                                          # f32 EUP (v5e-safe)

        # --- out_proj -> lane-dense (B, 768) f32 store.
        out = (jnp.dot(h.astype(WEIGHT_DTYPE), pw_ref[...],
                       preferred_element_type=jnp.float32) + pb_ref[...])
        out_ref[...] = out.astype(out_ref.dtype)

    return kernel


def cnn_classification_seq_forward(features, params, *, filter_sizes,
                                   emb_dim, n_filters, d_size):
    """Inference forward of CNNClassificationSeq (all dropouts = identity)."""
    B = features.shape[0]
    nfs = len(filter_sizes)
    seq_len = nfs
    wdt = WEIGHT_DTYPE
    f32 = jnp.float32

    # --- Wrapper-side weight preprocessing (bf16 cast, fused first layer, splits).
    w1 = _build_first_layer_block(
        params["conv_w"], params["lin_w"], filter_sizes=filter_sizes,
        seq_len=seq_len, emb_dim=emb_dim, n_filters=n_filters,
        d_size=d_size, dtype=wdt)
    conv_b = jnp.concatenate(
        [b.reshape(1, n_filters) for b in params["conv_b"]], axis=1).astype(f32)
    fcw_T = params["fc_w"].T                                       # (nfs*nf, d_size)
    fcw_splits = [fcw_T[i * n_filters:(i + 1) * n_filters, :].astype(wdt)
                  for i in range(nfs)]
    dwT = params["dense_w"].T                                      # (2*d_size, 768)

    inputs = ([features.astype(wdt), w1, conv_b,
               params["lin_b"].reshape(1, -1).astype(f32)]
              + fcw_splits
              + [params["fc_b"].reshape(1, -1).astype(f32),
                 dwT[:d_size, :].astype(wdt),                      # dw_top
                 dwT[d_size:, :].astype(wdt),                      # dw_bot
                 params["dense_b"].reshape(1, -1).astype(f32),
                 params["proj_w"].T.astype(wdt),
                 params["proj_b"].reshape(1, -1).astype(f32)])

    vmem_spec = pl.BlockSpec(memory_space=pltpu.MemorySpace.VMEM)
    return pl.pallas_call(
        _make_kernel(tuple(filter_sizes), emb_dim, n_filters, d_size),
        out_shape=jax.ShapeDtypeStruct((B, 768), jnp.float32),
        in_specs=[vmem_spec] * len(inputs),
        out_specs=vmem_spec,
        compiler_params=pltpu.CompilerParams(vmem_limit_bytes=8 * 1024 * 1024),
    )(*inputs)


def _reference_f32(features, params, *, filter_sizes, emb_dim, n_filters, d_size):
    """Pure-JAX f32 mirror of the PyTorch forward (inference)."""
    B = features.shape[0]
    x = features.reshape(B, -1, emb_dim)
    L = x.shape[1]
    pooled = []
    for i, fs in enumerate(filter_sizes):
        w = params["conv_w"][i]
        b = params["conv_b"][i]
        wm = jnp.transpose(w, (2, 1, 0)).reshape(fs * emb_dim, n_filters)
        outs = []
        for t in range(L - fs + 1):
            win = x[:, t:t + fs, :].reshape(B, fs * emb_dim)
            outs.append(win @ wm + b)
        conv = jnp.maximum(jnp.stack(outs, axis=-1), 0.0)
        pooled.append(jnp.max(conv, axis=-1))
    cat = jnp.concatenate(pooled, axis=1)
    cnn_out = cat @ params["fc_w"].T + params["fc_b"]
    feat_lin = features @ params["lin_w"].T + params["lin_b"]
    xx = jnp.concatenate([cnn_out, feat_lin], axis=-1)
    h = jnp.tanh(xx @ params["dense_w"].T + params["dense_b"])
    return h @ params["proj_w"].T + params["proj_b"]


def _reference_bf16_matched(features, params, *, filter_sizes, emb_dim,
                            n_filters, d_size):
    """Pure-JAX mirror with the SAME bf16 MXU-input rounding points as the
    kernel (weights + dot-input activations bf16, f32 accumulation/elementwise).
    Used for the tight correctness check."""
    wdt = WEIGHT_DTYPE
    B = features.shape[0]
    L = len(filter_sizes)
    feat = features.astype(wdt)
    pooled = []
    for i, fs in enumerate(filter_sizes):
        wm = jnp.transpose(params["conv_w"][i], (2, 1, 0)).reshape(
            fs * emb_dim, n_filters).astype(wdt)
        m = None
        for t in range(L - fs + 1):
            win = feat[:, t * emb_dim:(t + fs) * emb_dim]
            yt = jnp.dot(win, wm, preferred_element_type=jnp.float32)
            m = yt if m is None else jnp.maximum(m, yt)
        m = jnp.maximum(m + params["conv_b"][i].reshape(1, -1), 0.0)
        pooled.append(m.astype(wdt))
    fcw_T = params["fc_w"].T
    cnn_out = params["fc_b"].reshape(1, -1)
    for i in range(L):
        cnn_out = cnn_out + jnp.dot(
            pooled[i], fcw_T[i * n_filters:(i + 1) * n_filters, :].astype(wdt),
            preferred_element_type=jnp.float32)
    feat_lin = (jnp.dot(feat, params["lin_w"].T.astype(wdt),
                        preferred_element_type=jnp.float32)
                + params["lin_b"].reshape(1, -1))
    dwT = params["dense_w"].T
    pre = (jnp.dot(cnn_out.astype(wdt), dwT[:d_size, :].astype(wdt),
                   preferred_element_type=jnp.float32)
           + jnp.dot(feat_lin.astype(wdt), dwT[d_size:, :].astype(wdt),
                     preferred_element_type=jnp.float32)
           + params["dense_b"].reshape(1, -1))
    h = jnp.tanh(pre)
    return (jnp.dot(h.astype(wdt), params["proj_w"].T.astype(wdt),
                    preferred_element_type=jnp.float32)
            + params["proj_b"].reshape(1, -1))


if __name__ == "__main__":
    # Small shapes consistent with the module:
    #   config.hidden_size = 768 (required by reshape to (..., 768)),
    #   args.filter_size   = 2  -> conv kernel sizes [1, 2], seq len 2,
    #   args.cnn_size      = 8  -> n_filters,
    #   args.d_size        = 32,
    #   batch              = 2.
    hidden = 768
    filter_size = 2
    filter_sizes = tuple(range(1, filter_size + 1))
    n_filters = 8
    d_size = 32
    B = 2

    key = jax.random.PRNGKey(0)
    ks = list(jax.random.split(key, 12))
    nk = iter(ks)

    features = jax.random.normal(next(nk), (B, filter_size * hidden), jnp.float32)

    def w_init(k, out_f, in_f):
        return ((2.0 / in_f) ** 0.5
                * jax.random.normal(k, (out_f, in_f), jnp.float32))

    params = {
        "conv_w": [((2.0 / (hidden * fs)) ** 0.5
                    * jax.random.normal(next(nk), (n_filters, hidden, fs),
                                        jnp.float32))
                   for fs in filter_sizes],
        "conv_b": [jnp.full((n_filters,), 0.1, jnp.float32) for _ in filter_sizes],
        "fc_w": w_init(next(nk), d_size, filter_size * n_filters),
        "fc_b": jnp.zeros((d_size,), jnp.float32),
        "lin_w": w_init(next(nk), d_size, filter_size * hidden),
        "lin_b": jnp.zeros((d_size,), jnp.float32),
        "dense_w": w_init(next(nk), hidden, 2 * d_size),
        "dense_b": 0.01 * jax.random.normal(next(nk), (hidden,), jnp.float32),
        "proj_w": w_init(next(nk), 768, hidden),
        "proj_b": 0.01 * jax.random.normal(next(nk), (768,), jnp.float32),
    }

    out = cnn_classification_seq_forward(
        features, params, filter_sizes=filter_sizes, emb_dim=hidden,
        n_filters=n_filters, d_size=d_size)
    jax.block_until_ready(out)
    assert out.shape == (B, 768), out.shape

    # Tight check: kernel math matches the matched-precision (bf16 MXU inputs,
    # f32 accumulation) reference within the original 2e-3 tolerance.
    ref_bf16 = _reference_bf16_matched(
        features, params, filter_sizes=filter_sizes, emb_dim=hidden,
        n_filters=n_filters, d_size=d_size)
    err_bf16 = float(jnp.max(jnp.abs(out - ref_bf16)))
    assert jnp.allclose(out, ref_bf16, atol=2e-3, rtol=2e-3), \
        f"mismatch vs matched-precision reference, max_err={err_bf16}"

    # Approximation check: bf16 weight/activation rounding vs the pure-f32
    # PyTorch-equivalent forward stays inside a documented 3e-2 budget.
    ref_f32 = _reference_f32(
        features, params, filter_sizes=filter_sizes, emb_dim=hidden,
        n_filters=n_filters, d_size=d_size)
    err_f32 = float(jnp.max(jnp.abs(out - ref_f32)))
    assert jnp.allclose(out, ref_f32, atol=3e-2, rtol=3e-2), \
        f"bf16 approximation out of budget vs f32 reference, max_err={err_f32}"

    print("KERNEL_OK")
</pallas_src>

<mosaic_0001>
module attributes {stable_mosaic.version = 11 : i64} {
  func.func @kernel(%arg0: memref<2x1536xbf16, #tpu.memory_space<vmem>>, %arg1: memref<1536x56xbf16, #tpu.memory_space<vmem>>, %arg2: memref<1x16xf32, #tpu.memory_space<vmem>>, %arg3: memref<1x32xf32, #tpu.memory_space<vmem>>, %arg4: memref<8x32xbf16, #tpu.memory_space<vmem>>, %arg5: memref<8x32xbf16, #tpu.memory_space<vmem>>, %arg6: memref<1x32xf32, #tpu.memory_space<vmem>>, %arg7: memref<32x768xbf16, #tpu.memory_space<vmem>>, %arg8: memref<32x768xbf16, #tpu.memory_space<vmem>>, %arg9: memref<1x768xf32, #tpu.memory_space<vmem>>, %arg10: memref<768x768xbf16, #tpu.memory_space<vmem>>, %arg11: memref<1x768xf32, #tpu.memory_space<vmem>>, %arg12: memref<2x768xf32, #tpu.memory_space<vmem>>) attributes {dimension_semantics = [], scalar_prefetch = 0 : i64, scratch_operands = 0 : i64, tpu.core_type = #tpu.core_type<tc>} {
    %c0 = arith.constant 0 : index
    %c0_0 = arith.constant 0 : index
    %0 = vector.load %arg0[%c0, %c0_0] : memref<2x1536xbf16, #tpu.memory_space<vmem>>, vector<2x1536xbf16>
    %c0_1 = arith.constant 0 : index
    %c0_2 = arith.constant 0 : index
    %1 = vector.load %arg1[%c0_1, %c0_2] : memref<1536x56xbf16, #tpu.memory_space<vmem>>, vector<1536x56xbf16>
    %cst = arith.constant dense<0.000000e+00> : vector<2x56xf32>
    %2 = tpu.matmul %0, %1, %cst {dimension_numbers = #tpu.dot_dimension_numbers<[1], [0], [0], [1], [0, 0, 1, 1], [], []>} : vector<2x1536xbf16>, vector<1536x56xbf16>, vector<2x56xf32> -> vector<2x56xf32>
    %3 = vector.extract_strided_slice %2 {offsets = [0, 0], sizes = [2, 8], strides = [1, 1]} : vector<2x56xf32> to vector<2x8xf32>
    %4 = vector.extract_strided_slice %2 {offsets = [0, 8], sizes = [2, 8], strides = [1, 1]} : vector<2x56xf32> to vector<2x8xf32>
    %5 = arith.maximumf %3, %4 : vector<2x8xf32>
    %c0_3 = arith.constant 0 : index
    %c0_4 = arith.constant 0 : index
    %6 = vector.load %arg2[%c0_3, %c0_4] : memref<1x16xf32, #tpu.memory_space<vmem>>, vector<1x8xf32>
    %7 = vector.broadcast %6 : vector<1x8xf32> to vector<2x8xf32>
    %8 = arith.addf %5, %7 : vector<2x8xf32>
    %cst_5 = arith.constant 0.000000e+00 : f32
    %9 = vector.broadcast %cst_5 : f32 to vector<2x8xf32>
    %10 = arith.maximumf %8, %9 : vector<2x8xf32>
    %11 = arith.truncf %10 : vector<2x8xf32> to vector<2x8xbf16>
    %12 = vector.extract_strided_slice %2 {offsets = [0, 16], sizes = [2, 8], strides = [1, 1]} : vector<2x56xf32> to vector<2x8xf32>
    %c0_6 = arith.constant 0 : index
    %c8 = arith.constant 8 : index
    %13 = vector.load %arg2[%c0_6, %c8] : memref<1x16xf32, #tpu.memory_space<vmem>>, vector<1x8xf32>
    %14 = vector.broadcast %13 : vector<1x8xf32> to vector<2x8xf32>
    %15 = arith.addf %12, %14 : vector<2x8xf32>
    %cst_7 = arith.constant 0.000000e+00 : f32
    %16 = vector.broadcast %cst_7 : f32 to vector<2x8xf32>
    %17 = arith.maximumf %15, %16 : vector<2x8xf32>
    %18 = arith.truncf %17 : vector<2x8xf32> to vector<2x8xbf16>
    %19 = vector.extract_strided_slice %2 {offsets = [0, 24], sizes = [2, 32], strides = [1, 1]} : vector<2x56xf32> to vector<2x32xf32>
    %c0_8 = arith.constant 0 : index
    %c0_9 = arith.constant 0 : index
    %20 = vector.load %arg3[%c0_8, %c0_9] : memref<1x32xf32, #tpu.memory_space<vmem>>, vector<1x32xf32>
    %21 = vector.broadcast %20 : vector<1x32xf32> to vector<2x32xf32>
    %22 = arith.addf %19, %21 : vector<2x32xf32>
    %c0_10 = arith.constant 0 : index
    %c0_11 = arith.constant 0 : index
    %23 = vector.load %arg6[%c0_10, %c0_11] : memref<1x32xf32, #tpu.memory_space<vmem>>, vector<1x32xf32>
    %c0_12 = arith.constant 0 : index
    %c0_13 = arith.constant 0 : index
    %24 = vector.load %arg4[%c0_12, %c0_13] : memref<8x32xbf16, #tpu.memory_space<vmem>>, vector<8x32xbf16>
    %cst_14 = arith.constant dense<0.000000e+00> : vector<2x32xf32>
    %25 = tpu.matmul %11, %24, %cst_14 {dimension_numbers = #tpu.dot_dimension_numbers<[1], [0], [0], [1], [0, 0, 1, 1], [], []>} : vector<2x8xbf16>, vector<8x32xbf16>, vector<2x32xf32> -> vector<2x32xf32>
    %26 = vector.broadcast %23 : vector<1x32xf32> to vector<2x32xf32>
    %27 = arith.addf %26, %25 : vector<2x32xf32>
    %c0_15 = arith.constant 0 : index
    %c0_16 = arith.constant 0 : index
    %28 = vector.load %arg5[%c0_15, %c0_16] : memref<8x32xbf16, #tpu.memory_space<vmem>>, vector<8x32xbf16>
    %cst_17 = arith.constant dense<0.000000e+00> : vector<2x32xf32>
    %29 = tpu.matmul %18, %28, %cst_17 {dimension_numbers = #tpu.dot_dimension_numbers<[1], [0], [0], [1], [0, 0, 1, 1], [], []>} : vector<2x8xbf16>, vector<8x32xbf16>, vector<2x32xf32> -> vector<2x32xf32>
    %30 = arith.addf %27, %29 : vector<2x32xf32>
    %31 = arith.truncf %30 : vector<2x32xf32> to vector<2x32xbf16>
    %c0_18 = arith.constant 0 : index
    %c0_19 = arith.constant 0 : index
    %32 = vector.load %arg7[%c0_18, %c0_19] : memref<32x768xbf16, #tpu.memory_space<vmem>>, vector<32x768xbf16>
    %cst_20 = arith.constant dense<0.000000e+00> : vector<2x768xf32>
    %33 = tpu.matmul %31, %32, %cst_20 {dimension_numbers = #tpu.dot_dimension_numbers<[1], [0], [0], [1], [0, 0, 1, 1], [], []>} : vector<2x32xbf16>, vector<32x768xbf16>, vector<2x768xf32> -> vector<2x768xf32>
    %34 = arith.truncf %22 : vector<2x32xf32> to vector<2x32xbf16>
    %c0_21 = arith.constant 0 : index
    %c0_22 = arith.constant 0 : index
    %35 = vector.load %arg8[%c0_21, %c0_22] : memref<32x768xbf16, #tpu.memory_space<vmem>>, vector<32x768xbf16>
    %cst_23 = arith.constant dense<0.000000e+00> : vector<2x768xf32>
    %36 = tpu.matmul %34, %35, %cst_23 {dimension_numbers = #tpu.dot_dimension_numbers<[1], [0], [0], [1], [0, 0, 1, 1], [], []>} : vector<2x32xbf16>, vector<32x768xbf16>, vector<2x768xf32> -> vector<2x768xf32>
    %37 = arith.addf %33, %36 : vector<2x768xf32>
    %c0_24 = arith.constant 0 : index
    %c0_25 = arith.constant 0 : index
    %38 = vector.load %arg9[%c0_24, %c0_25] : memref<1x768xf32, #tpu.memory_space<vmem>>, vector<1x768xf32>
    %39 = vector.broadcast %38 : vector<1x768xf32> to vector<2x768xf32>
    %40 = arith.addf %37, %39 : vector<2x768xf32>
    %41 = math.tanh %40 : vector<2x768xf32>
    %42 = arith.truncf %41 : vector<2x768xf32> to vector<2x768xbf16>
    %c0_26 = arith.constant 0 : index
    %c0_27 = arith.constant 0 : index
    %43 = vector.load %arg10[%c0_26, %c0_27] : memref<768x768xbf16, #tpu.memory_space<vmem>>, vector<768x768xbf16>
    %cst_28 = arith.constant dense<0.000000e+00> : vector<2x768xf32>
    %44 = tpu.matmul %42, %43, %cst_28 {dimension_numbers = #tpu.dot_dimension_numbers<[1], [0], [0], [1], [0, 0, 1, 1], [], []>} : vector<2x768xbf16>, vector<768x768xbf16>, vector<2x768xf32> -> vector<2x768xf32>
    %c0_29 = arith.constant 0 : index
    %c0_30 = arith.constant 0 : index
    %45 = vector.load %arg11[%c0_29, %c0_30] : memref<1x768xf32, #tpu.memory_space<vmem>>, vector<1x768xf32>
    %46 = vector.broadcast %45 : vector<1x768xf32> to vector<2x768xf32>
    %47 = arith.addf %44, %46 : vector<2x768xf32>
    %c0_31 = arith.constant 0 : index
    %c0_32 = arith.constant 0 : index
    %48 = vector.load %arg12[%c0_31, %c0_32] : memref<2x768xf32, #tpu.memory_space<vmem>>, vector<2x768xf32>
    tpu.vector_store %arg12[%c0_31, %c0_32], %47 {strides = array<i32>} : memref<2x768xf32, #tpu.memory_space<vmem>>, vector<2x768xf32>,
    return
  }
}

</mosaic_0001>

<bundles_post_ra>
// kernel: tpu_custom_call.1
= control target key start
LH: loop header
LB: loop body
LE: loop exit
PB: predicated region body
PF: predicated region fallthrough
CT: control target
= control target key end

     0   :  { %17 = vsyncpa [#allocation3], 0  ;;  %s6179_s0 = inlined_call_operand.hbm [shape: bf16[2,1536], index: 0, kind: input, shape index: {}]   ;;  %s6180_s1 = inlined_call_operand.vmem [shape: bf16[1536,56], index: 1, kind: input, shape index: {}]   ;;  %s6181_s2 = inlined_call_operand.hbm [shape: f32[1,16], index: 2, kind: input, shape index: {}]   ;;  %s6182_s3 = inlined_call_operand.hbm [shape: f32[1,32], index: 3, kind: input, shape index: {}]   ;;  %s6183_s4 = inlined_call_operand.hbm [shape: bf16[8,32], index: 4, kind: input, shape index: {}]   ;;  %s6184_s5 = inlined_call_operand.hbm [shape: bf16[8,32], index: 5, kind: input, shape index: {}]   ;;  %s6185_s6 = inlined_call_operand.hbm [shape: f32[1,32], index: 6, kind: input, shape index: {}]   ;;  %s6186_s7 = inlined_call_operand.hbm [shape: bf16[32,768], index: 7, kind: input, shape index: {}]   ;;  %s6187_s8 = inlined_call_operand.hbm [shape: bf16[32,768], index: 8, kind: input, shape index: {}]   ;;  %s6188_s9 = inlined_call_operand.hbm [shape: f32[1,768], index: 9, kind: input, shape index: {}]   ;;  %s6189_s10 = inlined_call_operand.hbm [shape: bf16[768,768], index: 10, kind: input, shape index: {}]   ;;  %s6190_s11 = inlined_call_operand.hbm [shape: f32[1,768], index: 11, kind: input, shape index: {}]   ;;  %s6191_s12 = inlined_call_operand.hbm [shape: f32[2,768], index: 12, kind: output, shape index: {}]  }
   0x1   :  { %18 = vsyncpa [#allocation6], 0 }
   0x2   :  { %19 = vsyncpa [#allocation9], 0 }
   0x3   :  { %20 = vsyncpa [#allocation12], 0 }
   0x4   :  { %21 = vsyncpa [#allocation15], 0 }
   0x5   :  { %22 = vsyncpa [#allocation18], 0 }
   0x6   :  { %23 = vsyncpa [#allocation4], 0  ;;  %s5528_s21 = smov [#allocation5]   ;;  %s5529_s23 = smov [#allocation8]  }
   0x7   :  { %s42_s22 = sshll.u32 %s5528_s21, 4  ;;  %s62_s24 = sshll.u32 %s5529_s23, 4  ;;  %s43_s22 = int_to_ptr.vmem [resolvable:$true] %s42_s22  ;;  %s63_s24 = int_to_ptr.vmem [resolvable:$true] %s62_s24 }
   0x8   :  { %s5250_s27 = scalar_lea.hbm %s6181_s2, 16 }
   0x9   :  { %p5251_p0 = scmp.ne.s32.totalorder %s6181_s2, %s5250_s27  ;;  %p5254_p1 = scmp.lt.u32.totalorder %s5250_s27, %s6181_s2 }
   0xb   :  { %p5256_p2 = pnand %p5254_p1, %p5251_p0 }
   0xd   :  { %5259 = shalt.err (!%p5256_p2)
}
   0xe   :  { %s5260_s14 = scalar_lea.vmem %s43_s22, 16  ;;  %s5264_s15 = scalar_lea.vmem %s43_s22, 32 }
   0xf   :  { %p5261_p3 = scmp.ne.s32.totalorder %s43_s22, %s5260_s14  ;;  %p5265_p4 = scmp.lt.s32.totalorder %s43_s22, %s43_s22 }
  0x10   :  { %p5266_p5 = scmp.lt.s32.totalorder %s5264_s15, %s5260_s14 }
  0x12   :  { %p5267_p6 = por %p5266_p5, %p5265_p4 }
  0x14   :  { %p5268_p7 = pnand %p5267_p6, %p5261_p3 }
  0x16   :  { %5271 = shalt.err (!%p5268_p7)
}
  0x17   :  { %45 = dma.hbm_to_vmem [thread:$0]  %s6181_s2, 16, %s43_s22, [#allocation6]  }
  0x18   :  { %s5272_s20 = scalar_lea.hbm %s6183_s4, 64 }
  0x19   :  { %p5273_p8 = scmp.ne.s32.totalorder %s6183_s4, %s5272_s20  ;;  %p5276_p9 = scmp.lt.u32.totalorder %s5272_s20, %s6183_s4 }
  0x1b   :  { %p5278_p10 = pnand %p5276_p9, %p5273_p8 }
  0x1d   :  { %5281 = shalt.err (!%p5278_p10)
}
  0x1e   :  { %s5282_s27 = scalar_lea.vmem %s63_s24, 64  ;;  %p5287_p12 = scmp.lt.s32.totalorder %s63_s24, %s63_s24 }
  0x1f   :  { %p5283_p11 = scmp.ne.s32.totalorder %s63_s24, %s5282_s27  ;;  %p5288_p13 = scmp.lt.s32.totalorder %s5282_s27, %s5282_s27 }
  0x21   :  { %p5289_p0 = por %p5288_p13, %p5287_p12 }
  0x23   :  { %p5290_p1 = pnand %p5289_p0, %p5283_p11 }
  0x25   :  { %5293 = shalt.err (!%p5290_p1)
}
  0x26   :  { %65 = dma.hbm_to_vmem [thread:$0]  %s6183_s4, 64, %s63_s24, [#allocation9]  }
  0x27   :  { %s5530_s28 = smov [#allocation11]   ;;  %s5294_s14 = scalar_lea.hbm %s6185_s6, 16 }
  0x28   :  { %s82_s29 = sshll.u32 %s5530_s28, 4  ;;  %p5295_p2 = scmp.ne.s32.totalorder %s6185_s6, %s5294_s14  ;;  %s83_s29 = int_to_ptr.vmem [resolvable:$true] %s82_s29 }
  0x29   :  { %p5298_p3 = scmp.lt.u32.totalorder %s5294_s14, %s6185_s6 }
  0x2b   :  { %p5300_p4 = pnand %p5298_p3, %p5295_p2 }
  0x2d   :  { %5303 = shalt.err (!%p5300_p4)
}
  0x2e   :  { %s5304_s19 = scalar_lea.vmem %s83_s29, 16  ;;  %s5308_s4 = scalar_lea.vmem %s83_s29, 32 }
  0x2f   :  { %p5305_p5 = scmp.ne.s32.totalorder %s83_s29, %s5304_s19  ;;  %p5309_p6 = scmp.lt.s32.totalorder %s83_s29, %s83_s29 }
  0x30   :  { %p5310_p7 = scmp.lt.s32.totalorder %s5308_s4, %s5304_s19 }
  0x32   :  { %p5311_p8 = por %p5310_p7, %p5309_p6 }
  0x34   :  { %p5312_p9 = pnand %p5311_p8, %p5305_p5 }
  0x36   :  { %5315 = shalt.err (!%p5312_p9)
}
  0x37   :  { %85 = dma.hbm_to_vmem [thread:$0]  %s6185_s6, 16, %s83_s29, [#allocation12]  }
  0x38   :  { %s5531_s21 = smov [#allocation14]   ;;  %s5532_s25 = smov [#allocation17]  }
  0x39   :  { %s103_s23 = sshll.u32 %s5531_s21, 4  ;;  %s125_s26 = sshll.u32 %s5532_s25, 4  ;;  %s104_s23 = int_to_ptr.vmem [resolvable:$true] %s103_s23  ;;  %s126_s26 = int_to_ptr.vmem [resolvable:$true] %s125_s26 }
  0x3a   :  { %s5316_s22 = scalar_lea.hbm %s6187_s8, 1536 }
  0x3b   :  { %p5317_p10 = scmp.ne.s32.totalorder %s6187_s8, %s5316_s22  ;;  %p5320_p11 = scmp.lt.u32.totalorder %s5316_s22, %s6187_s8 }
  0x3d   :  { %p5322_p12 = pnand %p5320_p11, %p5317_p10 }
  0x3f   :  { %5325 = shalt.err (!%p5322_p12)
}
  0x40   :  { %s5326_s6 = scalar_lea.vmem %s104_s23, 1536  ;;  %p5331_p0 = scmp.lt.s32.totalorder %s104_s23, %s104_s23 }
  0x41   :  { %p5327_p13 = scmp.ne.s32.totalorder %s104_s23, %s5326_s6  ;;  %p5332_p1 = scmp.lt.s32.totalorder %s5326_s6, %s5326_s6 }
  0x43   :  { %p5333_p2 = por %p5332_p1, %p5331_p0 }
  0x45   :  { %p5334_p3 = pnand %p5333_p2, %p5327_p13 }
  0x47   :  { %5337 = shalt.err (!%p5334_p3)
}
  0x48   :  { %s5533_s29 = smov 384   ;;  %s5534_s15 = smov 24  }
  0x49   :  { %109 = dma.hbm_to_vmem [thread:$0]  %s6187_s8, 1536, %s104_s23, [#allocation15], %s5533_s29, %s5533_s29, %s5534_s15  }
  0x4a   :  { %s5338_s4 = scalar_lea.hbm %s6189_s10, 36864 }
  0x4b   :  { %p5339_p4 = scmp.ne.s32.totalorder %s6189_s10, %s5338_s4  ;;  %p5342_p5 = scmp.lt.u32.totalorder %s5338_s4, %s6189_s10 }
  0x4d   :  { %p5344_p6 = pnand %p5342_p5, %p5339_p4 }
  0x4f   :  { %5347 = shalt.err (!%p5344_p6)
}
  0x50   :  { %s5348_s27 = scalar_lea.vmem %s126_s26, 36864  ;;  %p5353_p8 = scmp.lt.s32.totalorder %s126_s26, %s126_s26 }
  0x51   :  { %p5349_p7 = scmp.ne.s32.totalorder %s126_s26, %s5348_s27  ;;  %p5354_p9 = scmp.lt.s32.totalorder %s5348_s27, %s5348_s27 }
  0x53   :  { %p5355_p10 = por %p5354_p9, %p5353_p8 }
  0x55   :  { %p5356_p11 = pnand %p5355_p10, %p5349_p7 }
  0x57   :  { %5359 = shalt.err (!%p5356_p11)
}
  0x58   :  { %131 = dma.hbm_to_vmem [thread:$0]  %s6189_s10, 36864, %s126_s26, [#allocation18], %s5533_s29, %s5533_s29, %s5534_s15  }
  0x59   :  { %s5535_s2 = smov [#allocation2]   ;;  %s5536_s28 = smov [#allocation7]  }
  0x5a   :  { %s30_s22 = sshll.u32 %s5535_s2, 4  ;;  %s52_s30 = sshll.u32 %s5536_s28, 4  ;;  %s31_s22 = int_to_ptr.vmem [resolvable:$true] %s30_s22  ;;  %s53_s30 = int_to_ptr.vmem [resolvable:$true] %s52_s30 }
  0x5b   :  { %s5360_s6 = scalar_lea.hbm %s6179_s0, 192 }
  0x5c   :  { %p5361_p12 = scmp.ne.s32.totalorder %s6179_s0, %s5360_s6  ;;  %p5364_p13 = scmp.lt.u32.totalorder %s5360_s6, %s6179_s0 }
  0x5e   :  { %p5366_p0 = pnand %p5364_p13, %p5361_p12 }
  0x60   :  { %5369 = shalt.err (!%p5366_p0)
}
  0x61   :  { %s5370_s10 = scalar_lea.vmem %s31_s22, 192  ;;  %p5375_p2 = scmp.lt.s32.totalorder %s31_s22, %s31_s22 }
  0x62   :  { %p5371_p1 = scmp.ne.s32.totalorder %s31_s22, %s5370_s10  ;;  %p5376_p3 = scmp.lt.s32.totalorder %s5370_s10, %s5370_s10 }
  0x64   :  { %p5377_p4 = por %p5376_p3, %p5375_p2 }
  0x66   :  { %p5378_p5 = pnand %p5377_p4, %p5371_p1 }
  0x68   :  { %5381 = shalt.err (!%p5378_p5)
}
  0x69   :  { %33 = dma.hbm_to_vmem [thread:$0]  %s6179_s0, 192, %s31_s22, [#allocation3]  }
  0x6a   :  { %s5382_s21 = scalar_lea.hbm %s6182_s3, 16 }
  0x6b   :  { %p5383_p6 = scmp.ne.s32.totalorder %s6182_s3, %s5382_s21  ;;  %p5386_p7 = scmp.lt.u32.totalorder %s5382_s21, %s6182_s3 }
  0x6d   :  { %p5388_p8 = pnand %p5386_p7, %p5383_p6 }
  0x6f   :  { %5391 = shalt.err (!%p5388_p8)
}
  0x70   :  { %s5392_s2 = scalar_lea.vmem %s53_s30, 16  ;;  %s5396_s28 = scalar_lea.vmem %s53_s30, 32 }
  0x71   :  { %p5393_p9 = scmp.ne.s32.totalorder %s53_s30, %s5392_s2  ;;  %p5397_p10 = scmp.lt.s32.totalorder %s53_s30, %s53_s30 }
  0x72   :  { %p5398_p11 = scmp.lt.s32.totalorder %s5396_s28, %s5392_s2 }
  0x74   :  { %p5399_p12 = por %p5398_p11, %p5397_p10 }
  0x76   :  { %p5400_p13 = pnand %p5399_p12, %p5393_p9 }
  0x78   :  { %5403 = shalt.err (!%p5400_p13)
}
  0x79   :  { %55 = dma.hbm_to_vmem [thread:$0]  %s6182_s3, 16, %s53_s30, [#allocation6]  }
  0x7a   :  { %s5537_s13 = smov [#allocation10]   ;;  %s5538_s6 = smov [#allocation13]  }
  0x7b   :  { %s72_s14 = sshll.u32 %s5537_s13, 4  ;;  %s91_s16 = sshll.u32 %s5538_s6, 4  ;;  %s73_s14 = int_to_ptr.vmem [resolvable:$true] %s72_s14  ;;  %s92_s16 = int_to_ptr.vmem [resolvable:$true] %s91_s16 }
  0x7c   :  { %s5404_s19 = scalar_lea.hbm %s6184_s5, 64 }
  0x7d   :  { %p5405_p0 = scmp.ne.s32.totalorder %s6184_s5, %s5404_s19  ;;  %p5408_p1 = scmp.lt.u32.totalorder %s5404_s19, %s6184_s5 }
  0x7f   :  { %p5410_p2 = pnand %p5408_p1, %p5405_p0 }
  0x81   :  { %5413 = shalt.err (!%p5410_p2)
}
  0x82   :  { %s5414_s3 = scalar_lea.vmem %s73_s14, 64  ;;  %p5419_p4 = scmp.lt.s32.totalorder %s73_s14, %s73_s14 }
  0x83   :  { %p5415_p3 = scmp.ne.s32.totalorder %s73_s14, %s5414_s3  ;;  %p5420_p5 = scmp.lt.s32.totalorder %s5414_s3, %s5414_s3 }
  0x85   :  { %p5421_p6 = por %p5420_p5, %p5419_p4 }
  0x87   :  { %p5422_p7 = pnand %p5421_p6, %p5415_p3 }
  0x89   :  { %5425 = shalt.err (!%p5422_p7)
}
  0x8a   :  { %75 = dma.hbm_to_vmem [thread:$0]  %s6184_s5, 64, %s73_s14, [#allocation9]  }
  0x8b   :  { %s5426_s27 = scalar_lea.hbm %s6186_s7, 1536 }
  0x8c   :  { %p5427_p8 = scmp.ne.s32.totalorder %s6186_s7, %s5426_s27  ;;  %p5430_p9 = scmp.lt.u32.totalorder %s5426_s27, %s6186_s7 }
  0x8e   :  { %p5432_p10 = pnand %p5430_p9, %p5427_p8 }
  0x90   :  { %5435 = shalt.err (!%p5432_p10)
}
  0x91   :  { %s5436_s0 = scalar_lea.vmem %s92_s16, 1536  ;;  %p5441_p12 = scmp.lt.s32.totalorder %s92_s16, %s92_s16 }
  0x92   :  { %p5437_p11 = scmp.ne.s32.totalorder %s92_s16, %s5436_s0  ;;  %p5442_p13 = scmp.lt.s32.totalorder %s5436_s0, %s5436_s0 }
  0x94   :  { %p5443_p0 = por %p5442_p13, %p5441_p12 }
  0x96   :  { %p5444_p1 = pnand %p5443_p0, %p5437_p11 }
  0x98   :  { %5447 = shalt.err (!%p5444_p1)
}
  0x99   :  { %97 = dma.hbm_to_vmem [thread:$0]  %s6186_s7, 1536, %s92_s16, [#allocation12], %s5533_s29, %s5533_s29, %s5534_s15  }
  0x9a   :  { %s5539_s13 = smov [#allocation16]   ;;  %s5540_s6 = smov [#allocation19]  }
  0x9b   :  { %s116_s14 = sshll.u32 %s5539_s13, 4  ;;  %s138_s17 = sshll.u32 %s5540_s6, 4  ;;  %s117_s14 = int_to_ptr.vmem [resolvable:$true] %s116_s14  ;;  %s139_s17 = int_to_ptr.vmem [resolvable:$true] %s138_s17 }
  0x9c   :  { %s5448_s10 = scalar_lea.hbm %s6188_s9, 96 }
  0x9d   :  { %p5449_p2 = scmp.ne.s32.totalorder %s6188_s9, %s5448_s10  ;;  %p5452_p3 = scmp.lt.u32.totalorder %s5448_s10, %s6188_s9 }
  0x9f   :  { %p5454_p4 = pnand %p5452_p3, %p5449_p2 }
  0xa1   :  { %5457 = shalt.err (!%p5454_p4)
}
  0xa2   :  { %s5458_s7 = scalar_lea.vmem %s117_s14, 96  ;;  %p5463_p6 = scmp.lt.s32.totalorder %s117_s14, %s117_s14 }
  0xa3   :  { %p5459_p5 = scmp.ne.s32.totalorder %s117_s14, %s5458_s7  ;;  %p5464_p7 = scmp.lt.s32.totalorder %s5458_s7, %s5458_s7 }
  0xa5   :  { %p5465_p8 = por %p5464_p7, %p5463_p6 }
  0xa7   :  { %p5466_p9 = pnand %p5465_p8, %p5459_p5 }
  0xa9   :  { %5469 = shalt.err (!%p5466_p9)
}
  0xaa   :  { %119 = dma.hbm_to_vmem [thread:$0]  %s6188_s9, 96, %s117_s14, [#allocation15]  }
  0xab   :  { %s5470_s21 = scalar_lea.hbm %s6190_s11, 96 }
  0xac   :  { %p5471_p10 = scmp.ne.s32.totalorder %s6190_s11, %s5470_s21  ;;  %p5474_p11 = scmp.lt.u32.totalorder %s5470_s21, %s6190_s11 }
  0xae   :  { %p5476_p12 = pnand %p5474_p11, %p5471_p10 }
  0xb0   :  { %5479 = shalt.err (!%p5476_p12)
}
  0xb1   :  { %s5480_s2 = scalar_lea.vmem %s139_s17, 96  ;;  %p5485_p0 = scmp.lt.s32.totalorder %s139_s17, %s139_s17 }
  0xb2   :  { %p5481_p13 = scmp.ne.s32.totalorder %s139_s17, %s5480_s2  ;;  %p5486_p1 = scmp.lt.s32.totalorder %s5480_s2, %s5480_s2 }
  0xb4   :  { %p5487_p2 = por %p5486_p1, %p5485_p0 }
  0xb6   :  { %p5488_p3 = pnand %p5487_p2, %p5481_p13 }
  0xb8   :  { %5491 = shalt.err (!%p5488_p3)
}
  0xb9   :  { %141 = dma.hbm_to_vmem [thread:$0]  %s6190_s11, 96, %s139_s17, [#allocation18]  }
  0xba   :  { %5514 = dma.done.wait [#allocation3], 192  }
  0xbb   :  { %5515 = vsyncadd [#allocation3], 4294967104 }
  0xbc   :  { %5516 = dma.done.wait [#allocation6], 32  }
  0xbd   :  { %5517 = vsyncadd [#allocation6], 4294967264 }
  0xbe   :  { %5518 = dma.done.wait [#allocation9], 128  }
  0xbf   :  { %5519 = vsyncadd [#allocation9], 4294967168 }
  0xc0   :  { %5520 = dma.done.wait [#allocation12], 1552  }
  0xc1   :  { %5521 = vsyncadd [#allocation12], 4294965744 }
  0xc2   :  { %5522 = dma.done.wait [#allocation15], 1632  }
  0xc3   :  { %5523 = vsyncadd [#allocation15], 4294965664 }
  0xc4   :  { %5524 = dma.done.wait [#allocation18], 36960  }
  0xc5   :  { %5525 = vsyncadd [#allocation18], 4294930336  ;;  %v4673_v0 = vld [vmem:[%s6180_s1 + $0x40] sm:$0xff]   ;;  %v4675_v2 = vld [vmem:[%s6180_s1 + $0x48] sm:$0xff]   ;;  %v5541_v5 = vmov 1966171168   ;;  %v376_v7 = vlaneseq }
  0xc6   :  { %v4674_v1 = vld [vmem:[%s6180_s1] sm:$0xff]   ;;  %4469 = vmatprep.subr.bf16.mxu1 %v4673_v0  ;;  %v4676_v3 = vld [vmem:[%s6180_s1 + $0x8] sm:$0xff]   ;;  %v4677_v4 = vld [vmem:[%s6180_s1 + $0x50] sm:$0xff]   ;;  %v374_v6 = vunpack.c.l.s4 %v5541_v5  ;;  %s5542_s0 = smov 8   ;;  %vm1310_vm0 = vcmask 1043456   ;;  %vm5544_vm1 = vmmov 0  }
  0xc7   :  { %4470 = vmatpush3.bf16.msra.mxu1 %v4674_v1  ;;  %v4678_v8 = vld [vmem:[%s6180_s1 + $0x10] sm:$0xff]   ;;  %v4679_v9 = vld [vmem:[%s6180_s1 + $0x58] sm:$0xff]   ;;  %v5778_v11 = vshrl.u32 %v376_v7, 7  ;;  %v4681_v13 = vld [vmem:[%s6180_s1 + $0x60] sm:$0xff]   ;;  %s5546_s2 = smov 112   ;;  %vm1306_vm2 = vcmask 64512  }
  0xc8   :  { %4471 = vmatprep.subr.bf16.mxu1 %v4675_v2  ;;  %v375_v10 = vunpack.c.0.s8 %v374_v6  ;;  %v4680_v12 = vld [vmem:[%s6180_s1 + $0x18] sm:$0xff]   ;;  %v4682_v15 = vld [vmem:[%s6180_s1 + $0x20] sm:$0xff]   ;;  %v4683_v16 = vld [vmem:[%s6180_s1 + $0x68] sm:$0xff]   ;;  %vm1501_vm3 = vcmask 261120   ;;  %s5550_s9 = smov [#allocation20]  }
  0xc9   :  { %v176_v17 = vld [vmem:[#allocation2] sm:$0xff]  ;;  %v4684_v18 = vld [vmem:[%s6180_s1 + $0x28] sm:$0xff]   ;;  %v4685_v21 = vld [vmem:[%s6180_s1 + $0x70] sm:$0xff]   ;;  %s4034_s28 = sshll.u32 %s5550_s9, 4  ;;  %s4035_s28 = int_to_ptr.vmem [resolvable:$true] %s4034_s28 }
  0xca   :  { %v5787_v14 = vsub.s32 %v375_v10, %v5778_v11  ;;  %v372_v20 = vcombine.high %v176_v17, %v176_v17  ;;  %v4691_v23 = vld [vmem:[%s6180_s1 + $0x140] sm:$0xff]   ;;  %v4686_v26 = vld [vmem:[%s6180_s1 + $0x30] sm:$0xff]   ;;  %v4687_v29 = vld [vmem:[%s6180_s1 + $0x78] sm:$0xff]   ;;  %p5497_p5 = scmp.lt.s32.totalorder %s4035_s28, %s4035_s28 }
  0xcb   :  { %4472 = vmatpush3.bf16.msra.mxu1 %v4676_v3  ;;  %v4692_v25 = vld [vmem:[%s6180_s1 + $0x100] sm:$0xff]   ;;  %4513 = vmatprep.subr.bf16.mxu0 %v4691_v23  ;;  %v4695_v30 = vld [vmem:[%s6180_s1 + $0x148] sm:$0xff]   ;;  %v4688_v33 = vld [vmem:[%s6180_s1 + $0x38] sm:$0xff]  }
  0xcc   :  { %4473 = vmatprep.subr.bf16.mxu1 %v4677_v4  ;;  %v379_v19 = vrot.slane %v176_v17, %v5787_v14  ;;  %v5806_v24 = vrot.slane %v372_v20, %v5787_v14  ;;  %4514 = vmatpush3.bf16.msra.mxu0 %v4692_v25  ;;  %v4696_v32 = vld [vmem:[%s6180_s1 + $0x108] sm:$0xff]   ;;  %v4689_v34 = vld [vmem:[%s6180_s1 + $0xc0] sm:$0xff]   ;;  %v4699_v35 = vld [vmem:[%s6180_s1 + $0x150] sm:$0xff]  }
  0xcd   :  { %4515 = vmatprep.subr.bf16.mxu0 %v4695_v30  ;;  %v4700_v36 = vld [vmem:[%s6180_s1 + $0x110] sm:$0xff]   ;;  %v4690_v37 = vld [vmem:[%s6180_s1 + $0x80] sm:$0xff]   ;;  %v4693_v39 = vld [vmem:[%s6180_s1 + $0xc8] sm:$0xff]  }
  0xce   :  { %v387_v22 = vcombine.high %v379_v19, %v379_v19  ;;  %v388_v28 = vcombine.high %v5806_v24, %v5806_v24  ;;  %v5846_v38 = vrot.slane %v379_v19, %v5787_v14  ;;  %v4703_v41 = vld [vmem:[%s6180_s1 + $0x158] sm:$0xff]   ;;  %v4694_v43 = vld [vmem:[%s6180_s1 + $0x88] sm:$0xff]   ;;  %v4697_v44 = vld [vmem:[%s6180_s1 + $0xd0] sm:$0xff]   ;;  %v5911_v60 = vrot.slane %v5806_v24, %v5787_v14 }
  0xcf   :  { %4474 = vmatpush3.bf16.msra.mxu1 %v4678_v8  ;;  %v4704_v42 = vld [vmem:[%s6180_s1 + $0x118] sm:$0xff]   ;;  %v4707_v45 = vld [vmem:[%s6180_s1 + $0x160] sm:$0xff]   ;;  %v4698_v47 = vld [vmem:[%s6180_s1 + $0x90] sm:$0xff]  }
  0xd0   :  { %4475 = vmatprep.subr.bf16.mxu1 %v4679_v9  ;;  %v409_v27 = vrot.slane %v387_v22, %v5787_v14  ;;  %v5824_v31 = vrot.slane %v388_v28, %v5787_v14  ;;  %4516 = vmatpush3.bf16.msra.mxu0 %v4696_v32  ;;  %v4708_v46 = vld [vmem:[%s6180_s1 + $0x120] sm:$0xff]   ;;  %v4701_v48 = vld [vmem:[%s6180_s1 + $0xd8] sm:$0xff]   ;;  %v4711_v49 = vld [vmem:[%s6180_s1 + $0x168] sm:$0xff]   ;;  %v417_v9 = vcombine.high %v5846_v38, %v5846_v38 }
  0xd1   :  { %4517 = vmatprep.subr.bf16.mxu0 %v4699_v35  ;;  %v4712_v50 = vld [vmem:[%s6180_s1 + $0x128] sm:$0xff]   ;;  %v4702_v51 = vld [vmem:[%s6180_s1 + $0x98] sm:$0xff]   ;;  %v4705_v52 = vld [vmem:[%s6180_s1 + $0xe0] sm:$0xff]  }
  0xd2   :  { %1065 = vmatprep.mubr.bf16.mxu1 %v409_v27  ;;  %1145 = vmatprep.mubr.bf16.mxu0 %v5824_v31  ;;  %v419_v40 = vcombine.high %v409_v27, %v409_v27  ;;  %v4715_v53 = vld [vmem:[%s6180_s1 + $0x170] sm:$0xff]   ;;  %v4706_v55 = vld [vmem:[%s6180_s1 + $0xa0] sm:$0xff]   ;;  %v4709_v56 = vld [vmem:[%s6180_s1 + $0xe8] sm:$0xff]  }
  0xd3   :  { %4476 = vmatpush3.bf16.msra.mxu1 %v4680_v12  ;;  %v4716_v54 = vld [vmem:[%s6180_s1 + $0x130] sm:$0xff]   ;;  %v4719_v57 = vld [vmem:[%s6180_s1 + $0x178] sm:$0xff]   ;;  %v4710_v59 = vld [vmem:[%s6180_s1 + $0xa8] sm:$0xff]   ;;  %v420_v12 = vcombine.high %v5824_v31, %v5824_v31 }
  0xd4   :  { %4477 = vmatprep.subr.bf16.mxu1 %v4681_v13  ;;  %4518 = vmatpush3.bf16.msra.mxu0 %v4700_v36  ;;  %v4720_v58 = vld [vmem:[%s6180_s1 + $0x138] sm:$0xff]   ;;  %v4713_v61 = vld [vmem:[%s6180_s1 + $0xf0] sm:$0xff]   ;;  %v4724_v62 = vld [vmem:[%s6180_s1 + $0x240] sm:$0xff]  }
  0xd5   :  { %4519 = vmatprep.subr.bf16.mxu0 %v4703_v41  ;;  %v4725_v63 = vld [vmem:[%s6180_s1 + $0x200] sm:$0xff]   ;;  %v4714_v0 = vld [vmem:[%s6180_s1 + $0xb0] sm:$0xff]   ;;  %v4717_v1 = vld [vmem:[%s6180_s1 + $0xf8] sm:$0xff]   ;;  %v418_v41 = vcombine.high %v5911_v60, %v5911_v60 }
  0xd6   :  { %v4728_v2 = vld [vmem:[%s6180_s1 + $0x248] sm:$0xff]   ;;  %v4718_v4 = vld [vmem:[%s6180_s1 + $0xb8] sm:$0xff]   ;;  %v4721_v5 = vld [vmem:[%s6180_s1 + $0x1c0] sm:$0xff]  }
  0xd7   :  { %4478 = vmatpush3.bf16.msra.mxu1 %v4682_v15  ;;  %v4729_v3 = vld [vmem:[%s6180_s1 + $0x208] sm:$0xff]   ;;  %v4732_v6 = vld [vmem:[%s6180_s1 + $0x250] sm:$0xff]   ;;  %v4723_v8 = vld [vmem:[%s6180_s1 + $0x180] sm:$0xff]  }
  0xd8   :  { %4479 = vmatprep.subr.bf16.mxu1 %v4683_v16  ;;  %4520 = vmatpush3.bf16.msra.mxu0 %v4704_v42  ;;  %v4733_v7 = vld [vmem:[%s6180_s1 + $0x210] sm:$0xff]   ;;  %v4726_v10 = vld [vmem:[%s6180_s1 + $0x1c8] sm:$0xff]   ;;  %v4736_v13 = vld [vmem:[%s6180_s1 + $0x258] sm:$0xff]  }
  0xd9   :  { %4521 = vmatprep.subr.bf16.mxu0 %v4707_v45  ;;  %v4737_v15 = vld [vmem:[%s6180_s1 + $0x218] sm:$0xff]   ;;  %v4727_v16 = vld [vmem:[%s6180_s1 + $0x188] sm:$0xff]   ;;  %v4730_v17 = vld [vmem:[%s6180_s1 + $0x1d0] sm:$0xff]  }
  0xda   :  { %v4741_v19 = vld [vmem:[%s6180_s1 + $0x220] sm:$0xff]   ;;  %v4731_v20 = vld [vmem:[%s6180_s1 + $0x190] sm:$0xff]   ;;  %v4744_v22 = vld [vmem:[%s6180_s1 + $0x268] sm:$0xff]  }
  0xdb   :  { %4480 = vmatpush3.bf16.msra.mxu1 %v4684_v18  ;;  %v4740_v18 = vld [vmem:[%s6180_s1 + $0x260] sm:$0xff]   ;;  %v4745_v23 = vld [vmem:[%s6180_s1 + $0x228] sm:$0xff]   ;;  %v4735_v24 = vld [vmem:[%s6180_s1 + $0x198] sm:$0xff]  }
  0xdc   :  { %4481 = vmatprep.subr.bf16.mxu1 %v4685_v21  ;;  %4522 = vmatpush3.bf16.msra.mxu0 %v4708_v46  ;;  %v4734_v21 = vld [vmem:[%s6180_s1 + $0x1d8] sm:$0xff]   ;;  %v4738_v25 = vld [vmem:[%s6180_s1 + $0x1e0] sm:$0xff]   ;;  %v4749_v27 = vld [vmem:[%s6180_s1 + $0x230] sm:$0xff]  }
  0xdd   :  { %4523 = vmatprep.subr.bf16.mxu0 %v4711_v49  ;;  %v4739_v28 = vld [vmem:[%s6180_s1 + $0x1a0] sm:$0xff]   ;;  %v4752_v30 = vld [vmem:[%s6180_s1 + $0x278] sm:$0xff]   ;;  %v4048_v32 = vld.sshfl [vmem:[#allocation2 + $0x8] sm:$0x33 pattern:$0x75316420] }
  0xde   :  { %v4753_v31 = vld [vmem:[%s6180_s1 + $0x238] sm:$0xff]   ;;  %v435_v35 = vrot.slane %v4048_v32, %v5787_v14  ;;  %v4746_v36 = vld [vmem:[%s6180_s1 + $0x1f0] sm:$0xff]   ;;  %v4755_v42 = vld [vmem:[%s6180_s1 + $0x280] sm:$0xff]  }
  0xdf   :  { %4482 = vmatpush3.bf16.msra.mxu1 %v4686_v26  ;;  %v4748_v26 = vld [vmem:[%s6180_s1 + $0x270] sm:$0xff]   ;;  %v6039_v45 = vld [vmem:[#allocation5] ss:$0 sm:$0xff]  ;;  %v4760_v49 = vld [vmem:[%s6180_s1 + $0x2d8] sm:$0xff]  }
  0xe0   :  { %4483 = vmatprep.subr.bf16.mxu1 %v4687_v29  ;;  %4524 = vmatpush3.bf16.msra.mxu0 %v4712_v50  ;;  %v4742_v29 = vld [vmem:[%s6180_s1 + $0x1e8] sm:$0xff]   ;;  %v4761_v50 = vld [vmem:[%s6180_s1 + $0x298] sm:$0xff]  }
  0xe1   :  { %4525 = vmatprep.subr.bf16.mxu0 %v4715_v53  ;;  %v4757_v46 = vld [vmem:[%s6180_s1 + $0x288] sm:$0xff]   ;;  %1288 = vrot.lane.b32.xlu0 %v6039_v45, %s5542_s0  ;;  %s5492_s0 = scalar_lea.vmem %s4035_s28, 192 }
  0xe2   :  { %v4764_v53 = vld [vmem:[%s6180_s1 + $0x2e8] sm:$0xff]   ;;  %p5493_p4 = scmp.ne.s32.totalorder %s4035_s28, %s5492_s0  ;;  %p5498_p6 = scmp.lt.s32.totalorder %s5492_s0, %s5492_s0 }
  0xe3   :  { %4484 = vmatpush3.bf16.msra.mxu1 %v4688_v33  ;;  %v428_v33 = vcombine.high %v4048_v32, %v4048_v32 }
  0xe4   :  { %4491 = vmatprep.subr.bf16.mxu1 %v4689_v34  ;;  %4526 = vmatpush3.bf16.msra.mxu0 %v4716_v54  ;;  %v4743_v34 = vld [vmem:[%s6180_s1 + $0x1a8] sm:$0xff]   ;;  %p5499_p7 = por %p5498_p6, %p5497_p5 }
  0xe5   :  { %4527 = vmatprep.subr.bf16.mxu0 %v4719_v57  ;;  %v4765_v54 = vld [vmem:[%s6180_s1 + $0x2a8] sm:$0xff]   ;;  %v4768_v57 = vld [vmem:[%s6180_s1 + $0x2f8] sm:$0xff]  }
  0xe6   :  { %1066 = vmatmul.mubr.bf16.vlgmr.msra.gmra.mrb[0].mxu1 %v5846_v38  ;;  %v4747_v38 = vld [vmem:[%s6180_s1 + $0x1b0] sm:$0xff]   ;;  %p5500_p8 = pnand %p5499_p7, %p5493_p4 }
  0xe7   :  { %4492 = vmatpush3.bf16.msra.mxu1 %v4690_v37  ;;  %1105 = vmatprep.mubr.bf16.mxu1 %v419_v40  ;;  %v442_v37 = vrot.slane %v428_v33, %v5787_v14  ;;  %v4751_v40 = vld [vmem:[%s6180_s1 + $0x1b8] sm:$0xff]   ;;  %v4754_v14 = vld [vmem:[%s6180_s1 + $0x2c0] sm:$0xff]  }
  0xe8   :  { %4493 = vmatprep.subr.bf16.mxu1 %v4693_v39  ;;  %4528 = vmatpush3.bf16.msra.mxu0 %v4720_v58  ;;  %v4750_v39 = vld [vmem:[%s6180_s1 + $0x1f8] sm:$0xff]  }
  0xe9   :  { %4557 = vmatprep.subr.bf16.mxu0 %v4724_v62  ;;  %v4769_v58 = vld [vmem:[%s6180_s1 + $0x2b8] sm:$0xff]  }
  0xeb   :  { %4494 = vmatpush3.bf16.msra.mxu1 %v4694_v43  ;;  %1146 = vmatmul.mubr.bf16.vlgmr.msra.gmra.mrb[0].mxu0 %v5911_v60  ;;  %v444_v43 = vcombine.high %v442_v37, %v442_v37  ;;  %v5543_v60 = vmov 0.0  }
  0xec   :  { %4495 = vmatprep.subr.bf16.mxu1 %v4697_v44  ;;  %4558 = vmatpush3.bf16.msra.mxu0 %v4725_v63  ;;  %v4756_v44 = vld [vmem:[%s6180_s1 + $0x2c8] sm:$0xff]  }
  0xed   :  { %4559 = vmatprep.subr.bf16.mxu0 %v4728_v2  ;;  %1225 = vmatprep.mubr.bf16.mxu0 %v442_v37 }
  0xef   :  { %4496 = vmatpush3.bf16.msra.mxu1 %v4698_v47  ;;  %v4758_v47 = vld [vmem:[%s6180_s1 + $0x2d0] sm:$0xff]  }
  0xf0   :  { %4497 = vmatprep.subr.bf16.mxu1 %v4701_v48  ;;  %4560 = vmatpush3.bf16.msra.mxu0 %v4729_v3  ;;  %v4759_v48 = vld [vmem:[%s6180_s1 + $0x290] sm:$0xff]  }
  0xf1   :  { %4561 = vmatprep.subr.bf16.mxu0 %v4732_v6 }
  0xf3   :  { %4498 = vmatpush3.bf16.msra.mxu1 %v4702_v51  ;;  %v4762_v51 = vld [vmem:[%s6180_s1 + $0x2e0] sm:$0xff]  }
  0xf4   :  { %4499 = vmatprep.subr.bf16.mxu1 %v4705_v52  ;;  %4562 = vmatpush3.bf16.msra.mxu0 %v4733_v7  ;;  %v4763_v52 = vld [vmem:[%s6180_s1 + $0x2a0] sm:$0xff]  }
  0xf5   :  { %4563 = vmatprep.subr.bf16.mxu0 %v4736_v13 }
  0xf7   :  { %4500 = vmatpush3.bf16.msra.mxu1 %v4706_v55  ;;  %v4766_v55 = vld [vmem:[%s6180_s1 + $0x2f0] sm:$0xff]  }
  0xf8   :  { %4501 = vmatprep.subr.bf16.mxu1 %v4709_v56  ;;  %4564 = vmatpush3.bf16.msra.mxu0 %v4737_v15  ;;  %v4767_v56 = vld [vmem:[%s6180_s1 + $0x2b0] sm:$0xff]   ;;  %s5545_s1 = smov 120  }
  0xf9   :  { %4565 = vmatprep.subr.bf16.mxu0 %v4740_v18 }
  0xfb   :  { %4502 = vmatpush3.bf16.msra.mxu1 %v4710_v59  ;;  %v443_v59 = vcombine.high %v435_v35, %v435_v35 }
  0xfc   :  { %4503 = vmatprep.subr.bf16.mxu1 %v4713_v61  ;;  %4566 = vmatpush3.bf16.msra.mxu0 %v4741_v19 }
  0xfd   :  { %4567 = vmatprep.subr.bf16.mxu0 %v4744_v22 }
  0xff   :  { %4504 = vmatpush3.bf16.msra.mxu1 %v4714_v0 }
 0x100   :  { %4505 = vmatprep.subr.bf16.mxu1 %v4717_v1  ;;  %4568 = vmatpush3.bf16.msra.mxu0 %v4745_v23 }
 0x101   :  { %4569 = vmatprep.subr.bf16.mxu0 %v4748_v26 }
 0x103   :  { %4506 = vmatpush3.bf16.msra.mxu1 %v4718_v4 }
 0x104   :  { %4535 = vmatprep.subr.bf16.mxu1 %v4721_v5  ;;  %4570 = vmatpush3.bf16.msra.mxu0 %v4749_v27 }
 0x105   :  { %4571 = vmatprep.subr.bf16.mxu0 %v4752_v30 }
 0x106   :  { %1106 = vmatmul.mubr.bf16.vlgmr.msra.gmra.mrb[4].mxu1 %v417_v9 }
 0x107   :  { %4536 = vmatpush3.bf16.msra.mxu1 %v4723_v8  ;;  %1185 = vmatprep.mubr.bf16.mxu1 %v420_v12 }
 0x108   :  { %4537 = vmatprep.subr.bf16.mxu1 %v4726_v10  ;;  %4572 = vmatpush3.bf16.msra.mxu0 %v4753_v31 }
 0x109   :  { %4605 = vmatprep.subr.bf16.mxu0 %v5543_v60 }
 0x10b   :  { %4538 = vmatpush3.bf16.msra.mxu1 %v4727_v16  ;;  %1226 = vmatmul.mubr.bf16.vlgmr.msra.gmra.mrb[4].mxu0 %v435_v35 }
 0x10c   :  { %4539 = vmatprep.subr.bf16.mxu1 %v4730_v17  ;;  %4607 = vmatprep.mubr.msk.bf16.mxu0 %vm5544_vm1, %v5543_v60 }
 0x10f   :  { %4540 = vmatpush3.bf16.msra.mxu1 %v4731_v20 }
 0x110   :  { %4541 = vmatprep.subr.bf16.mxu1 %v4734_v21 }
 0x113   :  { %4542 = vmatpush3.bf16.msra.mxu1 %v4735_v24 }
 0x114   :  { %4543 = vmatprep.subr.bf16.mxu1 %v4738_v25 }
 0x117   :  { %4544 = vmatpush3.bf16.msra.mxu1 %v4739_v28  ;;  %v1305_v28 = vld [vmem:[#allocation8] sm:$0xf] }
 0x118   :  { %4545 = vmatprep.subr.bf16.mxu1 %v4742_v29  ;;  %v1312_v29 = vsel %vm1310_vm0, %v1305_v28, 0  ;;  %v4806_v28 = vld [vmem:[#allocation17] ss:$24 sps:$4 sm:$0xff]  }
 0x119   :  { %4606 = vmatpush3.bf16.msra.mxu0 %v1312_v29  ;;  %v4814_v29 = vld [vmem:[#allocation17 + $0x34] ss:$24 sps:$4 sm:$0xff]  }
 0x11a   :  { %4611 = vmatprep.subr.bf16.mxu0 %v5543_v60 }
 0x11b   :  { %4546 = vmatpush3.bf16.msra.mxu1 %v4743_v34 }
 0x11c   :  { %4547 = vmatprep.subr.bf16.mxu1 %v4746_v36 }
 0x11f   :  { %4548 = vmatpush3.bf16.msra.mxu1 %v4747_v38 }
 0x120   :  { %4549 = vmatprep.subr.bf16.mxu1 %v4750_v39 }
 0x123   :  { %4550 = vmatpush3.bf16.msra.mxu1 %v4751_v40  ;;  %v4146_v40 = vld [vmem:[#allocation7] ss:$0 sm:$0xff] }
 0x124   :  { %4579 = vmatprep.subr.bf16.mxu1 %v4754_v14  ;;  %v4770_v14 = vld [vmem:[#allocation14] ss:$24 sps:$4 sm:$0xff]  }
 0x126   :  { %1186 = vmatmul.mubr.bf16.vlgmr.msra.gmra.mrb[8].mxu1 %v418_v41  ;;  %v4772_v41 = vld [vmem:[#allocation14 + $0x4] ss:$24 sps:$4 sm:$0xff]  }
 0x127   :  { %4580 = vmatpush3.bf16.msra.mxu1 %v4755_v42  ;;  %1265 = vmatprep.mubr.bf16.mxu1 %v444_v43  ;;  %v4778_v42 = vld [vmem:[#allocation14 + $0x34] ss:$24 sps:$4 sm:$0xff]   ;;  %v4776_v43 = vld [vmem:[#allocation14 + $0x30] ss:$24 sps:$4 sm:$0xff]  }
 0x128   :  { %4581 = vmatprep.subr.bf16.mxu1 %v4756_v44  ;;  %v5547_v44 = vmov 0  }
 0x12b   :  { %4582 = vmatpush3.bf16.msra.mxu1 %v4757_v46 }
 0x12c   :  { %4583 = vmatprep.subr.bf16.mxu1 %v4758_v47  ;;  %v4784_v47 = vld [vmem:[#allocation14 + $0xc] ss:$24 sps:$4 sm:$0xff]  }
 0x12f   :  { %4584 = vmatpush3.bf16.msra.mxu1 %v4759_v48 }
 0x130   :  { %4585 = vmatprep.subr.bf16.mxu1 %v4760_v49 }
 0x133   :  { %4586 = vmatpush3.bf16.msra.mxu1 %v4761_v50  ;;  %v1361_v50 = vld [vmem:[#allocation10] sm:$0xf] }
 0x134   :  { %4587 = vmatprep.subr.bf16.mxu1 %v4762_v51 }
 0x137   :  { %4588 = vmatpush3.bf16.msra.mxu1 %v4763_v52 }
 0x138   :  { %4589 = vmatprep.subr.bf16.mxu1 %v4764_v53 }
 0x13b   :  { %4590 = vmatpush3.bf16.msra.mxu1 %v4765_v54  ;;  %v1369_v54 = vsel %vm1310_vm0, %v1361_v50, 0  ;;  %v4851_v50 = vld [vmem:[#allocation17 + $0x450] ss:$24 sps:$4 sm:$0xff]  }
 0x13c   :  { %4591 = vmatprep.subr.bf16.mxu1 %v4766_v55  ;;  %v4775_v55 = vld [vmem:[#allocation14 + $0x14] ss:$24 sps:$4 sm:$0xff]  }
 0x13f   :  { %4592 = vmatpush3.bf16.msra.mxu1 %v4767_v56 }
 0x140   :  { %4593 = vmatprep.subr.bf16.mxu1 %v4768_v57 }
 0x143   :  { %4594 = vmatpush3.bf16.msra.mxu1 %v4769_v58 }
 0x144   :  { %1505 = vmatprep.subr.bf16.mxu1 %v4772_v41  ;;  %v4839_v41 = vld [vmem:[#allocation17 + $0x3f0] ss:$24 sps:$4 sm:$0xff]  }
 0x146   :  { %1266 = vmatmul.mubr.bf16.vlgmr.msra.gmra.mrb[12].mxu1 %v443_v59  ;;  %v4781_v59 = vld [vmem:[#allocation14 + $0x44] ss:$24 sps:$4 sm:$0xff]  }
 0x147   :  { %1506 = vmatpush1.bf16.msra.mxu1 %v4770_v14  ;;  %1537 = vmatprep.mubr.bf16.mxu1 %v5547_v44  ;;  %v4832_v14 = vld [vmem:[#allocation17 + $0xc4] ss:$24 sps:$4 sm:$0xff]  }
 0x148   :  { %1507 = vmatprep.subr.bf16.mxu1 %v4778_v42  ;;  %v4847_v42 = vld [vmem:[#allocation17 + $0x424] ss:$24 sps:$4 sm:$0xff]  }
 0x14b   :  { %1508 = vmatpush1.bf16.msra.mxu1 %v4776_v43  ;;  %v4830_v43 = vld [vmem:[#allocation17 + $0xc0] ss:$24 sps:$4 sm:$0xff]  }
 0x14c   :  { %1546 = vmatprep.subr.bf16.mxu1 %v4784_v47  ;;  %v4853_v47 = vld [vmem:[#allocation17 + $0x454] ss:$24 sps:$4 sm:$0xff]  }
 0x153   :  { %v1289_v35 = vpop.permute.xlu0 %1288 }
 0x1b9   :  { %v4485_v61 = vpop.f32.mrb[0].mxu1 }
 0x1ba   :  { %v4486_v62 = vpop.f32.mrb[1].mxu1 }
 0x1bb   :  { %v4487_v63 = vadd.f32 %v4486_v62, %v4485_v61  ;;  %v4488_v0 = vpop.f32.mrb[2].mxu1  ;;  %v4779_v61 = vld [vmem:[#allocation14 + $0x40] ss:$24 sps:$4 sm:$0xff]   ;;  %v4790_v62 = vld [vmem:[#allocation13 + $0xc] ss:$24 sps:$4 sm:$0xff]  }
 0x1bc   :  { %v4489_v1 = vpop.f32.mrb[3].mxu1  ;;  %v4787_v0 = vld [vmem:[#allocation14 + $0x3c] ss:$24 sps:$4 sm:$0xff]  }
 0x1be   :  { %v4529_v2 = vpop.f32.mrb[0].mxu0 }
 0x1bf   :  { %v4530_v3 = vpop.f32.mrb[1].mxu0 }
 0x1c0   :  { %v4531_v4 = vadd.f32 %v4530_v3, %v4529_v2  ;;  %v4532_v5 = vpop.f32.mrb[2].mxu0  ;;  %v4796_v2 = vld [vmem:[#allocation13 + $0x3c] ss:$24 sps:$4 sm:$0xff]   ;;  %v4785_v3 = vld [vmem:[#allocation14 + $0x38] ss:$24 sps:$4 sm:$0xff]  }
 0x1c1   :  { %v4533_v6 = vpop.f32.mrb[3].mxu0  ;;  %v4794_v5 = vld [vmem:[#allocation13 + $0x38] ss:$24 sps:$4 sm:$0xff]  }
 0x1c2   :  { %v4791_v6 = vld [vmem:[#allocation13] ss:$24 sps:$4 sm:$0xff]  }
 0x1d9   :  { %v4507_v7 = vpop.f32.mrb[4].mxu1 }
 0x1da   :  { %v4508_v8 = vpop.f32.mrb[5].mxu1 }
 0x1db   :  { %v4509_v9 = vadd.f32 %v4508_v8, %v4507_v7  ;;  %v4510_v10 = vpop.f32.mrb[6].mxu1  ;;  %v4799_v7 = vld [vmem:[#allocation13 + $0x34] ss:$24 sps:$4 sm:$0xff]   ;;  %v4797_v8 = vld [vmem:[#allocation13 + $0x30] ss:$24 sps:$4 sm:$0xff]  }
 0x1dc   :  { %v4511_v12 = vpop.f32.mrb[7].mxu1  ;;  %v4811_v10 = vld [vmem:[#allocation17 + $0x304] ss:$24 sps:$4 sm:$0xff]  }
 0x1dd   :  { %v1108_v13 = vadd.f32 %v4509_v9, %v4487_v63  ;;  %v4782_v63 = vld [vmem:[#allocation14 + $0x8] ss:$24 sps:$4 sm:$0xff]   ;;  %v4802_v9 = vld [vmem:[#allocation13 + $0x14] ss:$24 sps:$4 sm:$0xff]   ;;  %v4148_v12 = vld [vmem:[#allocation11] ss:$0 sm:$0xff] }
 0x1de   :  { %v4573_v16 = vpop.f32.mrb[4].mxu0 }
 0x1df   :  { %v1148_v15 = vadd.f32 %v4531_v4, %v1108_v13  ;;  %v4574_v17 = vpop.f32.mrb[5].mxu0  ;;  %v4793_v4 = vld [vmem:[#allocation13 + $0x4] ss:$24 sps:$4 sm:$0xff]  }
 0x1e0   :  { %v4575_v18 = vadd.f32 %v4574_v17, %v4573_v16  ;;  %v4576_v19 = vpop.f32.mrb[6].mxu0 }
 0x1e1   :  { %v4577_v20 = vpop.f32.mrb[7].mxu0 }
 0x1f9   :  { %v4551_v21 = vpop.f32.mrb[8].mxu1 }
 0x1fa   :  { %v4552_v22 = vpop.f32.mrb[9].mxu1 }
 0x1fb   :  { %v4553_v23 = vadd.f32 %v4552_v22, %v4551_v21  ;;  %v4554_v24 = vpop.f32.mrb[10].mxu1  ;;  %v4805_v21 = vld [vmem:[#allocation13 + $0x44] ss:$24 sps:$4 sm:$0xff]  }
 0x1fc   :  { %v4555_v25 = vpop.f32.mrb[11].mxu1  ;;  %v4809_v22 = vld [vmem:[#allocation17 + $0x300] ss:$24 sps:$4 sm:$0xff]  }
 0x1fd   :  { %v1188_v26 = vadd.f32 %v4553_v23, %v1148_v15  ;;  %v4817_v23 = vld [vmem:[#allocation17 + $0x334] ss:$24 sps:$4 sm:$0xff]   ;;  %v4808_v25 = vld [vmem:[#allocation17 + $0x4] ss:$24 sps:$4 sm:$0xff]  }
 0x1fe   :  { %v4803_v24 = vld [vmem:[#allocation13 + $0x40] ss:$24 sps:$4 sm:$0xff]  }
 0x1ff   :  { %v1228_v27 = vadd.f32 %v4575_v18, %v1188_v26  ;;  %v4800_v18 = vld [vmem:[#allocation13 + $0x10] ss:$24 sps:$4 sm:$0xff]  }
 0x200   :  { %v4815_v26 = vld [vmem:[#allocation17 + $0x330] ss:$24 sps:$4 sm:$0xff]  }
 0x219   :  { %v4595_v30 = vpop.f32.mrb[12].mxu1 }
 0x21a   :  { %v4596_v31 = vpop.f32.mrb[13].mxu1 }
 0x21b   :  { %v4597_v32 = vadd.f32 %v4596_v31, %v4595_v30  ;;  %v4598_v33 = vpop.f32.mrb[14].mxu1  ;;  %v4821_v30 = vld [vmem:[#allocation17 + $0x360] ss:$24 sps:$4 sm:$0xff]   ;;  %v4829_v31 = vld [vmem:[#allocation17 + $0x394] ss:$24 sps:$4 sm:$0xff]  }
 0x21c   :  { %v4599_v34 = vpop.f32.mrb[15].mxu1  ;;  %v4820_v33 = vld [vmem:[#allocation17 + $0x64] ss:$24 sps:$4 sm:$0xff]  }
 0x21d   :  { %v1268_v36 = vadd.f32 %v4597_v32, %v1228_v27  ;;  %v4823_v27 = vld [vmem:[#allocation17 + $0x364] ss:$24 sps:$4 sm:$0xff]   ;;  %v4812_v32 = vld [vmem:[#allocation17 + $0x30] ss:$24 sps:$4 sm:$0xff]  }
 0x21e   :  { %v4827_v34 = vld [vmem:[#allocation17 + $0x390] ss:$24 sps:$4 sm:$0xff]  }
 0x21f   :  { %v1291_v37 = vadd.f32 %v1289_v35, %v1268_v36  ;;  %1274 = vrot.lane.b32.xlu0 %v1268_v36, %s5545_s1  ;;  %v4835_v35 = vld [vmem:[#allocation17 + $0x3c4] ss:$24 sps:$4 sm:$0xff]  }
 0x221   :  { %v1292_v38 = vmax.f32 %v1291_v37, 0.0  ;;  %v4826_v37 = vld [vmem:[#allocation17 + $0x94] ss:$24 sps:$4 sm:$0xff]  }
 0x223   :  { %v1293_v39 = vpack.c.bf16 %v1292_v38, %v1292_v38  ;;  %v4833_v38 = vld [vmem:[#allocation17 + $0x3c0] ss:$24 sps:$4 sm:$0xff]  }
 0x225   :  { %1363 = vrot.lane.b32.xlu1 %v1293_v39, %s5546_s2  ;;  %v4841_v39 = vld [vmem:[#allocation17 + $0x3f4] ss:$24 sps:$4 sm:$0xff]  }
 0x229   :  { %1300 = vrot.lane.b32.xlu1 %v4146_v40, %s5534_s15  ;;  %s5548_s15 = smov 104   ;;  %v4824_v40 = vld [vmem:[#allocation17 + $0x90] ss:$24 sps:$4 sm:$0xff]  }
 0x291   :  { %v1275_v46 = vpop.permute.xlu0 %1274 }
 0x292   :  { %v1277_v48 = vmax.f32 %v1268_v36, %v1275_v46  ;;  %v4845_v46 = vld [vmem:[#allocation17 + $0x420] ss:$24 sps:$4 sm:$0xff]  }
 0x294   :  { %v1285_v49 = vadd.f32 %v6039_v45, %v1277_v48  ;;  %v4773_v45 = vld [vmem:[#allocation14 + $0x10] ss:$24 sps:$4 sm:$0xff]  }
 0x295   :  { %v4836_v48 = vld [vmem:[#allocation17 + $0xf0] ss:$24 sps:$4 sm:$0xff]  }
 0x296   :  { %v1286_v51 = vmax.f32 %v1285_v49, 0.0  ;;  %v4844_v49 = vld [vmem:[#allocation17 + $0x124] ss:$24 sps:$4 sm:$0xff]  }
 0x297   :  { %v1364_v52 = vpop.permute.xlu1 %1363 }
 0x298   :  { %v1287_v53 = vpack.c.bf16 %v1286_v51, %v1286_v51  ;;  %v4859_v51 = vld [vmem:[#allocation17 + $0x484] ss:$24 sps:$4 sm:$0xff]  }
 0x29a   :  { %4608 = vmatmul.mubr.msk.bf16.vlgmr.msra.gmra.mrb[8].mxu0 %vm1306_vm2, %v1287_v53  ;;  %v4850_v53 = vld [vmem:[#allocation17 + $0x154] ss:$24 sps:$4 sm:$0xff]  }
 0x29b   :  { %4612 = vmatpush3.bf16.msra.mxu0 %v1369_v54  ;;  %v1301_v56 = vpop.permute.xlu1 %1300  ;;  %4613 = vmatprep.mubr.msk.bf16.mxu0 %vm5544_vm1, %v5543_v60  ;;  %v4788_v60 = vld [vmem:[#allocation13 + $0x8] ss:$24 sps:$4 sm:$0xff]  }
 0x29c   :  { %v1303_v57 = vadd.f32 %v1301_v56, %v1268_v36  ;;  %1587 = vmatprep.subr.bf16.mxu0 %v4775_v55  ;;  %v4818_v36 = vld [vmem:[#allocation17 + $0x60] ss:$24 sps:$4 sm:$0xff]   ;;  %v4865_v55 = vld [vmem:[#allocation17 + $0x4b4] ss:$24 sps:$4 sm:$0xff]   ;;  %v4848_v56 = vld [vmem:[#allocation17 + $0x150] ss:$24 sps:$4 sm:$0xff]  }
 0x29d   :  { %v4857_v54 = vld [vmem:[#allocation17 + $0x480] ss:$24 sps:$4 sm:$0xff]  }
 0x29e   :  { %v1425_v58 = vpack.c.bf16 %v1303_v57, %v1303_v57  ;;  %v4856_v57 = vld [vmem:[#allocation17 + $0x184] ss:$24 sps:$4 sm:$0xff]  }
 0x2a0   :  { %1439 = vrot.lane.b32.xlu0 %v1425_v58, %s5548_s15  ;;  %v4863_v58 = vld [vmem:[#allocation17 + $0x4b0] ss:$24 sps:$4 sm:$0xff]  }
 0x2a6   :  { %4614 = vmatmul.mubr.msk.bf16.vlgmr.msra.gmra.mrb[8].mxu0 %vm1306_vm2, %v1364_v52  ;;  %v4842_v52 = vld [vmem:[#allocation17 + $0x120] ss:$24 sps:$4 sm:$0xff]  }
 0x2a7   :  { %1588 = vmatpush1.bf16.msra.mxu0 %v4773_v45  ;;  %1619 = vmatprep.mubr.bf16.mxu0 %v5547_v44  ;;  %v4871_v45 = vld [vmem:[#allocation17 + $0x4e4] ss:$24 sps:$4 sm:$0xff]  }
 0x2a8   :  { %1589 = vmatprep.subr.bf16.mxu0 %v4781_v59  ;;  %v4854_v59 = vld [vmem:[#allocation17 + $0x180] ss:$24 sps:$4 sm:$0xff]  }
 0x2ab   :  { %1590 = vmatpush1.bf16.msra.mxu0 %v4779_v61  ;;  %v4862_v61 = vld [vmem:[#allocation17 + $0x1b4] ss:$24 sps:$4 sm:$0xff]  }
 0x2ac   :  { %1732 = vmatprep.subr.bf16.mxu0 %v4790_v62  ;;  %v4869_v62 = vld [vmem:[#allocation17 + $0x4e0] ss:$24 sps:$4 sm:$0xff]  }
 0x312   :  { %v1440_v1 = vpop.permute.xlu0 %1439 }
 0x313   :  { %4162 = vmatmul.mubr.msk.bf16.vlgmr.msra.gmra.mrb[16].mxu1 %vm1501_vm3, %v1440_v1  ;;  %4164 = vmatmul.mubr.msk.bf16.vlgmr.msra.gmra.mrb[12].mxu0 %vm1501_vm3, %v1440_v1 }
 0x314   :  { %1547 = vmatpush1.bf16.msra.mxu1 %v4782_v63  ;;  %1578 = vmatprep.mubr.bf16.mxu1 %v5547_v44  ;;  %v4877_v63 = vld [vmem:[#allocation17 + $0x514] ss:$24 sps:$4 sm:$0xff]  }
 0x315   :  { %1548 = vmatprep.subr.bf16.mxu1 %v4787_v0  ;;  %1733 = vmatpush1.bf16.msra.mxu0 %v4788_v60  ;;  %v4860_v0 = vld [vmem:[#allocation17 + $0x1b0] ss:$24 sps:$4 sm:$0xff]   ;;  %v4868_v60 = vld [vmem:[#allocation17 + $0x1e4] ss:$24 sps:$4 sm:$0xff]  }
 0x316   :  { %1734 = vmatprep.subr.bf16.mxu0 %v4796_v2  ;;  %1764 = vmatprep.mubr.bf16.mxu0 %v5547_v44  ;;  %v4866_v2 = vld [vmem:[#allocation17 + $0x1e0] ss:$24 sps:$4 sm:$0xff]  }
 0x318   :  { %1549 = vmatpush1.bf16.msra.mxu1 %v4785_v3  ;;  %v4874_v3 = vld [vmem:[#allocation17 + $0x214] ss:$24 sps:$4 sm:$0xff]  }
 0x319   :  { %1691 = vmatprep.subr.bf16.mxu1 %v4793_v4  ;;  %1735 = vmatpush1.bf16.msra.mxu0 %v4794_v5  ;;  %v4872_v4 = vld [vmem:[#allocation17 + $0x210] ss:$24 sps:$4 sm:$0xff]   ;;  %v4880_v5 = vld [vmem:[#allocation17 + $0x244] ss:$24 sps:$4 sm:$0xff]  }
 0x31a   :  { %3665 = vmatprep.subr.bf16.mxu0 %v4811_v10  ;;  %v4889_v10 = vld [vmem:[#allocation17 + $0x574] ss:$24 sps:$4 sm:$0xff]  }
 0x31b   :  { %4163 = vmatmul.mubr.msk.bf16.vlgmr.msra.gmra.mrb[20].mxu1 %vm1501_vm3, %v1440_v1  ;;  %v4875_v1 = vld [vmem:[#allocation17 + $0x510] ss:$24 sps:$4 sm:$0xff]  }
 0x31c   :  { %1692 = vmatpush1.bf16.msra.mxu1 %v4791_v6  ;;  %1723 = vmatprep.mubr.bf16.mxu1 %v5547_v44  ;;  %v4883_v6 = vld [vmem:[#allocation17 + $0x544] ss:$24 sps:$4 sm:$0xff]  }
 0x31d   :  { %1693 = vmatprep.subr.bf16.mxu1 %v4799_v7  ;;  %v4878_v7 = vld [vmem:[#allocation17 + $0x240] ss:$24 sps:$4 sm:$0xff]  }
 0x320   :  { %1694 = vmatpush1.bf16.msra.mxu1 %v4797_v8  ;;  %v4881_v8 = vld [vmem:[#allocation17 + $0x540] ss:$24 sps:$4 sm:$0xff]  }
 0x321   :  { %1773 = vmatprep.subr.bf16.mxu1 %v4802_v9  ;;  %v4886_v9 = vld [vmem:[#allocation17 + $0x274] ss:$24 sps:$4 sm:$0xff]  }
 0x379   :  { %v1405_v13 = vpop.f32.mrb[8].mxu0 }
 0x37a   :  { %v4617_v15 = vadd.f32 %v4148_v12, %v1405_v13  ;;  %v4615_v16 = vpop.f32.mrb[9].mxu0  ;;  %v4884_v12 = vld [vmem:[#allocation17 + $0x270] ss:$24 sps:$4 sm:$0xff]  }
 0x37b   :  { %v1408_v17 = vpop.f32.mrb[10].mxu0  ;;  %v4887_v13 = vld [vmem:[#allocation17 + $0x570] ss:$24 sps:$4 sm:$0xff]   ;;  %v4895_v16 = vld [vmem:[#allocation17 + $0x5a4] ss:$24 sps:$4 sm:$0xff]  }
 0x37c   :  { %v1412_v19 = vpack.c.bf16 %v4617_v15, %v4617_v15  ;;  %v4616_v20 = vpop.f32.mrb[11].mxu0  ;;  %v4892_v15 = vld [vmem:[#allocation17 + $0x2a4] ss:$24 sps:$4 sm:$0xff]   ;;  %v4890_v17 = vld [vmem:[#allocation17 + $0x2a0] ss:$24 sps:$4 sm:$0xff]  }
 0x37d   :  { %v4901_v20 = vld [vmem:[#allocation17 + $0x5d4] ss:$24 sps:$4 sm:$0xff]  }
 0x37e   :  { %4177 = vmatmul.mubr.msk.bf16.vlgmr.msra.gmra.mrb[24].mxu1 %vm1501_vm3, %v1412_v19  ;;  %4178 = vmatmul.mubr.msk.bf16.vlgmr.msra.gmra.mrb[16].mxu0 %vm1501_vm3, %v1412_v19 }
 0x37f   :  { %1774 = vmatpush1.bf16.msra.mxu1 %v4800_v18  ;;  %1805 = vmatprep.mubr.bf16.mxu1 %v5547_v44  ;;  %v4838_v44 = vld [vmem:[#allocation17 + $0xf4] ss:$24 sps:$4 sm:$0xff]   ;;  %v4893_v18 = vld [vmem:[#allocation17 + $0x5a0] ss:$24 sps:$4 sm:$0xff]  }
 0x380   :  { %1775 = vmatprep.subr.bf16.mxu1 %v4805_v21  ;;  %3666 = vmatpush1.bf16.msra.mxu0 %v4809_v22  ;;  %v4896_v21 = vld [vmem:[#allocation17 + $0x2d0] ss:$24 sps:$4 sm:$0xff]  }
 0x381   :  { %3667 = vmatprep.subr.bf16.mxu0 %v4817_v23  ;;  %v4899_v22 = vld [vmem:[#allocation17 + $0x5d0] ss:$24 sps:$4 sm:$0xff]   ;;  %v4904_v23 = vld [vmem:[#allocation17 + $0x604] ss:$24 sps:$4 sm:$0xff]  }
 0x383   :  { %1776 = vmatpush1.bf16.msra.mxu1 %v4803_v24  ;;  %v4907_v24 = vld [vmem:[#allocation17 + $0xc] ss:$24 sps:$4 sm:$0xff]  }
 0x384   :  { %3624 = vmatprep.subr.bf16.mxu1 %v4808_v25  ;;  %3668 = vmatpush1.bf16.msra.mxu0 %v4815_v26 }
 0x385   :  { %3669 = vmatprep.subr.bf16.mxu0 %v4823_v27 }
 0x386   :  { %4179 = vmatmul.mubr.msk.bf16.vlgmr.msra.gmra.mrb[28].mxu1 %vm1501_vm3, %v1412_v19  ;;  %v4898_v19 = vld [vmem:[#allocation17 + $0x2d4] ss:$24 sps:$4 sm:$0xff]  }
 0x387   :  { %3625 = vmatpush1.bf16.msra.mxu1 %v4806_v28 }
 0x388   :  { %3626 = vmatprep.subr.bf16.mxu1 %v4814_v29  ;;  %3670 = vmatpush1.bf16.msra.mxu0 %v4821_v30 }
 0x389   :  { %3671 = vmatprep.subr.bf16.mxu0 %v4829_v31 }
 0x38b   :  { %3627 = vmatpush1.bf16.msra.mxu1 %v4812_v32 }
 0x38c   :  { %3628 = vmatprep.subr.bf16.mxu1 %v4820_v33  ;;  %3672 = vmatpush1.bf16.msra.mxu0 %v4827_v34 }
 0x38d   :  { %3673 = vmatprep.subr.bf16.mxu0 %v4835_v35 }
 0x38f   :  { %3629 = vmatpush1.bf16.msra.mxu1 %v4818_v36 }
 0x390   :  { %3630 = vmatprep.subr.bf16.mxu1 %v4826_v37  ;;  %3674 = vmatpush1.bf16.msra.mxu0 %v4833_v38  ;;  %v1818_v37 = vsub.s32 0, %v5778_v11  ;;  %v1826_v38 = vsub.s32 2, %v5778_v11 }
 0x391   :  { %3675 = vmatprep.subr.bf16.mxu0 %v4841_v39  ;;  %v1814_v39 = vld [vmem:[#allocation16] sm:$0x3f] }
 0x393   :  { %3631 = vmatpush1.bf16.msra.mxu1 %v4824_v40  ;;  %v1822_v40 = vsub.s32 1, %v5778_v11 }
 0x394   :  { %3632 = vmatprep.subr.bf16.mxu1 %v4832_v14  ;;  %3676 = vmatpush1.bf16.msra.mxu0 %v4839_v41  ;;  %v1830_v14 = vsub.s32 3, %v5778_v11  ;;  %v1819_v41 = vrot.slane %v1814_v39, %v1818_v37 }
 0x395   :  { %3677 = vmatprep.subr.bf16.mxu0 %v4847_v42  ;;  %v1827_v42 = vrot.slane %v1814_v39, %v1826_v38 }
 0x397   :  { %3633 = vmatpush1.bf16.msra.mxu1 %v4830_v43 }
 0x398   :  { %3634 = vmatprep.subr.bf16.mxu1 %v4838_v44  ;;  %3678 = vmatpush1.bf16.msra.mxu0 %v4845_v46  ;;  %v1823_v46 = vrot.slane %v1814_v39, %v1822_v40 }
 0x399   :  { %3679 = vmatprep.subr.bf16.mxu0 %v4853_v47  ;;  %v1831_v47 = vrot.slane %v1814_v39, %v1830_v14 }
 0x39b   :  { %3635 = vmatpush1.bf16.msra.mxu1 %v4836_v48 }
 0x39c   :  { %3636 = vmatprep.subr.bf16.mxu1 %v4844_v49  ;;  %3680 = vmatpush1.bf16.msra.mxu0 %v4851_v50 }
 0x39d   :  { %3681 = vmatprep.subr.bf16.mxu0 %v4859_v51 }
 0x39f   :  { %3637 = vmatpush1.bf16.msra.mxu1 %v4842_v52 }
 0x3a0   :  { %3638 = vmatprep.subr.bf16.mxu1 %v4850_v53  ;;  %3682 = vmatpush1.bf16.msra.mxu0 %v4857_v54 }
 0x3a1   :  { %3683 = vmatprep.subr.bf16.mxu0 %v4865_v55 }
 0x3a3   :  { %3639 = vmatpush1.bf16.msra.mxu1 %v4848_v56 }
 0x3a4   :  { %3640 = vmatprep.subr.bf16.mxu1 %v4856_v57  ;;  %3684 = vmatpush1.bf16.msra.mxu0 %v4863_v58 }
 0x3a5   :  { %3685 = vmatprep.subr.bf16.mxu0 %v4871_v45 }
 0x3a7   :  { %3641 = vmatpush1.bf16.msra.mxu1 %v4854_v59  ;;  %v1834_v59 = vsub.s32 4, %v5778_v11 }
 0x3a8   :  { %3642 = vmatprep.subr.bf16.mxu1 %v4862_v61  ;;  %3686 = vmatpush1.bf16.msra.mxu0 %v4869_v62 }
 0x3a9   :  { %3687 = vmatprep.subr.bf16.mxu0 %v4877_v63  ;;  %v1838_v63 = vsub.s32 5, %v5778_v11 }
 0x3ab   :  { %3643 = vmatpush1.bf16.msra.mxu1 %v4860_v0  ;;  %v1835_v0 = vrot.slane %v1814_v39, %v1834_v59 }
 0x3ac   :  { %3644 = vmatprep.subr.bf16.mxu1 %v4868_v60  ;;  %3688 = vmatpush1.bf16.msra.mxu0 %v4875_v1  ;;  %v1839_v1 = vrot.slane %v1814_v39, %v1838_v63  ;;  %v4929_v39 = vld [vmem:[#allocation17 + $0xc8] ss:$24 sps:$4 sm:$0xff]  }
 0x3ad   :  { %3689 = vmatprep.subr.bf16.mxu0 %v4883_v6 }
 0x3af   :  { %3645 = vmatpush1.bf16.msra.mxu1 %v4866_v2 }
 0x3b0   :  { %3646 = vmatprep.subr.bf16.mxu1 %v4874_v3  ;;  %3690 = vmatpush1.bf16.msra.mxu0 %v4881_v8 }
 0x3b1   :  { %3691 = vmatprep.subr.bf16.mxu0 %v4889_v10 }
 0x3b3   :  { %3647 = vmatpush1.bf16.msra.mxu1 %v4872_v4 }
 0x3b4   :  { %3648 = vmatprep.subr.bf16.mxu1 %v4880_v5  ;;  %3692 = vmatpush1.bf16.msra.mxu0 %v4887_v13 }
 0x3b5   :  { %3693 = vmatprep.subr.bf16.mxu0 %v4895_v16  ;;  %v4905_v16 = vld [vmem:[#allocation17 + $0x8] ss:$24 sps:$4 sm:$0xff]  }
 0x3b7   :  { %3649 = vmatpush1.bf16.msra.mxu1 %v4878_v7 }
 0x3b8   :  { %3650 = vmatprep.subr.bf16.mxu1 %v4886_v9  ;;  %3694 = vmatpush1.bf16.msra.mxu0 %v4893_v18 }
 0x3b9   :  { %3695 = vmatprep.subr.bf16.mxu0 %v4901_v20 }
 0x3bb   :  { %3651 = vmatpush1.bf16.msra.mxu1 %v4884_v12 }
 0x3bc   :  { %3652 = vmatprep.subr.bf16.mxu1 %v4892_v15  ;;  %3696 = vmatpush1.bf16.msra.mxu0 %v4899_v22  ;;  %v4913_v22 = vld [vmem:[#allocation17 + $0x3c] ss:$24 sps:$4 sm:$0xff]  }
 0x3bd   :  { %3706 = vmatprep.subr.bf16.mxu0 %v4904_v23  ;;  %v4911_v23 = vld [vmem:[#allocation17 + $0x38] ss:$24 sps:$4 sm:$0xff]  }
 0x3bf   :  { %3653 = vmatpush1.bf16.msra.mxu1 %v4890_v17 }
 0x3c0   :  { %3654 = vmatprep.subr.bf16.mxu1 %v4898_v19  ;;  %v4902_v19 = vld [vmem:[#allocation17 + $0x600] ss:$24 sps:$4 sm:$0xff]  }
 0x3c3   :  { %3655 = vmatpush1.bf16.msra.mxu1 %v4896_v21  ;;  %v4910_v21 = vld [vmem:[#allocation17 + $0x634] ss:$24 sps:$4 sm:$0xff]  }
 0x3c4   :  { %3747 = vmatprep.subr.bf16.mxu1 %v4907_v24  ;;  %v4908_v24 = vld [vmem:[#allocation17 + $0x630] ss:$24 sps:$4 sm:$0xff]  }
 0x3e6   :  { %v1539_v25 = vpop.f32.mrb[16].mxu1  ;;  %v1621_v26 = vpop.f32.mrb[12].mxu0 }
 0x3e7   :  { %v1541_v27 = vpop.f32.mrb[17].mxu1  ;;  %v1623_v28 = vpop.f32.mrb[13].mxu0 }
 0x3e8   :  { %v1543_v29 = vpop.f32.mrb[18].mxu1  ;;  %v1625_v30 = vpop.f32.mrb[14].mxu0 }
 0x3e9   :  { %v1544_v31 = vpop.f32.mrb[19].mxu1  ;;  %v1626_v32 = vpop.f32.mrb[15].mxu0  ;;  %v4917_v29 = vld [vmem:[#allocation17 + $0x68] ss:$24 sps:$4 sm:$0xff]  }
 0x3ea   :  { %v4914_v30 = vld [vmem:[#allocation17 + $0x660] ss:$24 sps:$4 sm:$0xff]   ;;  %v4925_v31 = vld [vmem:[#allocation17 + $0x9c] ss:$24 sps:$4 sm:$0xff]  }
 0x3eb   :  { %v4922_v32 = vld [vmem:[#allocation17 + $0x694] ss:$24 sps:$4 sm:$0xff]  }
 0x3ee   :  { %v1580_v33 = vpop.f32.mrb[20].mxu1 }
 0x3ef   :  { %v1582_v34 = vpop.f32.mrb[21].mxu1 }
 0x3f0   :  { %v1584_v35 = vpop.f32.mrb[22].mxu1 }
 0x3f1   :  { %v1585_v36 = vpop.f32.mrb[23].mxu1  ;;  %v4931_v35 = vld [vmem:[#allocation17 + $0xcc] ss:$24 sps:$4 sm:$0xff]  }
 0x3f2   :  { %v4928_v36 = vld [vmem:[#allocation17 + $0x6c4] ss:$24 sps:$4 sm:$0xff]  }
 0x451   :  { %v1725_v43 = vpop.f32.mrb[24].mxu1  ;;  %v1766_v44 = vpop.f32.mrb[16].mxu0 }
 0x452   :  { %v1726_v48 = vadd.f32 %v1725_v43, %v1539_v25  ;;  %v1767_v49 = vadd.f32 %v1766_v44, %v1580_v33  ;;  %v1727_v50 = vpop.f32.mrb[25].mxu1  ;;  %v1768_v51 = vpop.f32.mrb[17].mxu0  ;;  %v4923_v33 = vld [vmem:[#allocation17 + $0x98] ss:$24 sps:$4 sm:$0xff]   ;;  %v4934_v43 = vld [vmem:[#allocation17 + $0x6f4] ss:$24 sps:$4 sm:$0xff]  }
 0x453   :  { %v1728_v52 = vadd.f32 %v1727_v50, %v1541_v27  ;;  %v1769_v53 = vadd.f32 %v1768_v51, %v1582_v34  ;;  %v1729_v54 = vpop.f32.mrb[26].mxu1  ;;  %v1770_v55 = vpop.f32.mrb[18].mxu0  ;;  %v4919_v27 = vld [vmem:[#allocation17 + $0x6c] ss:$24 sps:$4 sm:$0xff]   ;;  %v4920_v34 = vld [vmem:[#allocation17 + $0x690] ss:$24 sps:$4 sm:$0xff]  }
 0x454   :  { %v1846_v56 = vadd.f32 %v1819_v41, %v1726_v48  ;;  %v1848_v57 = vadd.f32 %v1827_v42, %v1767_v49  ;;  %v1730_v58 = vpop.f32.mrb[27].mxu1  ;;  %v1771_v45 = vpop.f32.mrb[19].mxu0  ;;  %v4926_v41 = vld [vmem:[#allocation17 + $0x6c0] ss:$24 sps:$4 sm:$0xff]   ;;  %v4937_v42 = vld [vmem:[#allocation17 + $0xfc] ss:$24 sps:$4 sm:$0xff]  }
 0x455   :  { %v1847_v61 = vadd.f32 %v1823_v46, %v1728_v52  ;;  %v1849_v62 = vadd.f32 %v1831_v47, %v1769_v53  ;;  %v4935_v44 = vld [vmem:[#allocation17 + $0xf8] ss:$24 sps:$4 sm:$0xff]   ;;  %v4943_v47 = vld [vmem:[#allocation17 + $0x12c] ss:$24 sps:$4 sm:$0xff]   ;;  %v4941_v49 = vld [vmem:[#allocation17 + $0x128] ss:$24 sps:$4 sm:$0xff]  }
 0x456   :  { %5238 = vtanh.f32 %v1846_v56  ;;  %v4932_v46 = vld [vmem:[#allocation17 + $0x6f0] ss:$24 sps:$4 sm:$0xff]   ;;  %v4940_v48 = vld [vmem:[#allocation17 + $0x724] ss:$24 sps:$4 sm:$0xff]   ;;  %v4938_v50 = vld [vmem:[#allocation17 + $0x720] ss:$24 sps:$4 sm:$0xff]  }
 0x457   :  { %5240 = vtanh.f32 %v1848_v57  ;;  %v4949_v51 = vld [vmem:[#allocation17 + $0x15c] ss:$24 sps:$4 sm:$0xff]   ;;  %v4947_v53 = vld [vmem:[#allocation17 + $0x158] ss:$24 sps:$4 sm:$0xff]   ;;  %v4955_v55 = vld [vmem:[#allocation17 + $0x18c] ss:$24 sps:$4 sm:$0xff]  }
 0x458   :  { %5242 = vtanh.f32 %v1847_v61  ;;  %v4946_v52 = vld [vmem:[#allocation17 + $0x754] ss:$24 sps:$4 sm:$0xff]   ;;  %v4944_v54 = vld [vmem:[#allocation17 + $0x750] ss:$24 sps:$4 sm:$0xff]   ;;  %v4952_v56 = vld [vmem:[#allocation17 + $0x784] ss:$24 sps:$4 sm:$0xff]  }
 0x459   :  { %5244 = vtanh.f32 %v1849_v62  ;;  %v1807_v60 = vpop.f32.mrb[28].mxu1  ;;  %v4953_v57 = vld [vmem:[#allocation17 + $0x188] ss:$24 sps:$4 sm:$0xff]   ;;  %v4961_v45 = vld [vmem:[#allocation17 + $0x1bc] ss:$24 sps:$4 sm:$0xff]  }
 0x45a   :  { %v1808_v2 = vadd.f32 %v1807_v60, %v1621_v26  ;;  %v1809_v3 = vpop.f32.mrb[29].mxu1  ;;  %v4916_v26 = vld [vmem:[#allocation17 + $0x664] ss:$24 sps:$4 sm:$0xff]   ;;  %v4950_v58 = vld [vmem:[#allocation17 + $0x780] ss:$24 sps:$4 sm:$0xff]  }
 0x45b   :  { %v1810_v4 = vadd.f32 %v1809_v3, %v1623_v28  ;;  %v1811_v5 = vpop.f32.mrb[30].mxu1  ;;  %v4958_v61 = vld [vmem:[#allocation17 + $0x7b4] ss:$24 sps:$4 sm:$0xff]   ;;  %v4959_v62 = vld [vmem:[#allocation17 + $0x1b8] ss:$24 sps:$4 sm:$0xff]  }
 0x45c   :  { %v6121_v6 = vadd.f32 %v1835_v0, %v1808_v2  ;;  %v1812_v7 = vpop.f32.mrb[31].mxu1  ;;  %v4956_v0 = vld [vmem:[#allocation17 + $0x7b0] ss:$24 sps:$4 sm:$0xff]   ;;  %v4967_v60 = vld [vmem:[#allocation17 + $0x1ec] ss:$24 sps:$4 sm:$0xff]  }
 0x45d   :  { %v1851_v8 = vadd.f32 %v1839_v1, %v1810_v4  ;;  %v4964_v1 = vld [vmem:[#allocation17 + $0x7e4] ss:$24 sps:$4 sm:$0xff]   ;;  %v4965_v2 = vld [vmem:[#allocation17 + $0x1e8] ss:$24 sps:$4 sm:$0xff]   ;;  %v4970_v5 = vld [vmem:[#allocation17 + $0x814] ss:$24 sps:$4 sm:$0xff]  }
 0x45e   :  { %v4962_v3 = vld [vmem:[#allocation17 + $0x7e0] ss:$24 sps:$4 sm:$0xff]   ;;  %v4973_v4 = vld [vmem:[#allocation17 + $0x21c] ss:$24 sps:$4 sm:$0xff]  }
 0x45f   :  { %5246 = vtanh.f32 %v1851_v8  ;;  %v4971_v7 = vld [vmem:[#allocation17 + $0x218] ss:$24 sps:$4 sm:$0xff]  }
 0x460   :  { %v5239_v9 = vpop.eup %5238  ;;  %v4968_v8 = vld [vmem:[#allocation17 + $0x810] ss:$24 sps:$4 sm:$0xff]   ;;  %5248 = vtanh.f32 %v6121_v6  ;;  %v5000_v6 = vld [vmem:[#allocation17 + $0x30c] ss:$24 sps:$4 sm:$0xff]  }
 0x461   :  { %v5241_v10 = vpop.eup %5240  ;;  %v6125_v17 = vpack.c.bf16 %v5239_v9, %v5239_v9  ;;  %v4979_v9 = vld [vmem:[#allocation17 + $0x24c] ss:$24 sps:$4 sm:$0xff]  }
 0x462   :  { %v5243_v12 = vpop.eup %5242  ;;  %v6129_v20 = vpack.c.bf16 %v5241_v10, %v5241_v10  ;;  %v4976_v10 = vld [vmem:[#allocation17 + $0x844] ss:$24 sps:$4 sm:$0xff]  }
 0x463   :  { %v5245_v13 = vpop.eup %5244  ;;  %v6123_v15 = vpack.c.bf16 %v5243_v12, %v5243_v12  ;;  %v4977_v12 = vld [vmem:[#allocation17 + $0x248] ss:$24 sps:$4 sm:$0xff]  }
 0x464   :  { %v6127_v18 = vpack.c.bf16 %v5245_v13, %v5245_v13  ;;  %v4974_v13 = vld [vmem:[#allocation17 + $0x840] ss:$24 sps:$4 sm:$0xff]  }
 0x465   :  { %3656 = vmatprep.mubr.bf16.mxu1 %v6123_v15 }
 0x466   :  { %3697 = vmatprep.mubr.bf16.mxu0 %v6127_v18  ;;  %3657 = vmatmul.mubr.bf16.vlgmr.msra.gmra.mrb[32].mxu1 %v6125_v17 }
 0x467   :  { %3698 = vmatmul.mubr.bf16.vlgmr.msra.gmra.mrb[20].mxu0 %v6129_v20  ;;  %3748 = vmatpush1.bf16.msra.mxu1 %v4905_v16  ;;  %v4985_v16 = vld [vmem:[#allocation17 + $0x27c] ss:$24 sps:$4 sm:$0xff]  }
 0x468   :  { %3707 = vmatpush1.bf16.msra.mxu0 %v4902_v19  ;;  %3779 = vmatprep.mubr.bf16.mxu1 %v6123_v15  ;;  %v4982_v19 = vld [vmem:[#allocation17 + $0x874] ss:$24 sps:$4 sm:$0xff]  }
 0x469   :  { %v5247_v25 = vpop.eup %5246  ;;  %3708 = vmatprep.subr.bf16.mxu0 %v4910_v21  ;;  %3749 = vmatprep.subr.bf16.mxu1 %v4913_v22  ;;  %v4983_v21 = vld [vmem:[#allocation17 + $0x278] ss:$24 sps:$4 sm:$0xff]  }
 0x46a   :  { %v6136_v28 = vpack.c.bf16 %v5247_v25, %v5247_v25  ;;  %v4980_v22 = vld [vmem:[#allocation17 + $0x870] ss:$24 sps:$4 sm:$0xff]  }
 0x46b   :  { %3750 = vmatpush1.bf16.msra.mxu1 %v4911_v23  ;;  %v4991_v23 = vld [vmem:[#allocation17 + $0x2ac] ss:$24 sps:$4 sm:$0xff]   ;;  %v4989_v25 = vld [vmem:[#allocation17 + $0x2a8] ss:$24 sps:$4 sm:$0xff]  }
 0x46c   :  { %3709 = vmatpush1.bf16.msra.mxu0 %v4908_v24  ;;  %3738 = vmatprep.mubr.bf16.mxu0 %v6136_v28  ;;  %v4988_v24 = vld [vmem:[#allocation17 + $0x8a4] ss:$24 sps:$4 sm:$0xff]  }
 0x46d   :  { %3710 = vmatprep.subr.bf16.mxu0 %v4916_v26  ;;  %3751 = vmatprep.subr.bf16.mxu1 %v4919_v27  ;;  %v4986_v26 = vld [vmem:[#allocation17 + $0x8a0] ss:$24 sps:$4 sm:$0xff]   ;;  %v4997_v27 = vld [vmem:[#allocation17 + $0x2dc] ss:$24 sps:$4 sm:$0xff]  }
 0x46f   :  { %3752 = vmatpush1.bf16.msra.mxu1 %v4917_v29  ;;  %v4994_v29 = vld [vmem:[#allocation17 + $0x8d4] ss:$24 sps:$4 sm:$0xff]  }
 0x470   :  { %3711 = vmatpush1.bf16.msra.mxu0 %v4914_v30  ;;  %3753 = vmatprep.subr.bf16.mxu1 %v4925_v31  ;;  %v4995_v30 = vld [vmem:[#allocation17 + $0x2d8] ss:$24 sps:$4 sm:$0xff]  }
 0x471   :  { %3712 = vmatprep.subr.bf16.mxu0 %v4922_v32  ;;  %v4992_v31 = vld [vmem:[#allocation17 + $0x8d0] ss:$24 sps:$4 sm:$0xff]   ;;  %v5003_v32 = vld [vmem:[#allocation17 + $0x14] ss:$24 sps:$4 sm:$0xff]  }
 0x473   :  { %3754 = vmatpush1.bf16.msra.mxu1 %v4923_v33  ;;  %v5249_v33 = vpop.eup %5248 }
 0x474   :  { %3713 = vmatpush1.bf16.msra.mxu0 %v4920_v34  ;;  %3755 = vmatprep.subr.bf16.mxu1 %v4931_v35  ;;  %v4998_v34 = vld [vmem:[#allocation17 + $0x308] ss:$24 sps:$4 sm:$0xff]  }
 0x475   :  { %3714 = vmatprep.subr.bf16.mxu0 %v4928_v36  ;;  %v5001_v35 = vld [vmem:[#allocation17 + $0x10] ss:$24 sps:$4 sm:$0xff]   ;;  %v6140_v36 = vpack.c.bf16 %v5249_v33, %v5249_v33  ;;  %v5081_v33 = vld [vmem:[#allocation17 + $0x284] ss:$24 sps:$4 sm:$0xff]  }
 0x477   :  { %3756 = vmatpush1.bf16.msra.mxu1 %v4929_v39  ;;  %v5006_v39 = vld [vmem:[#allocation17 + $0x33c] ss:$24 sps:$4 sm:$0xff]  }
 0x478   :  { %3715 = vmatpush1.bf16.msra.mxu0 %v4926_v41  ;;  %3757 = vmatprep.subr.bf16.mxu1 %v4937_v42  ;;  %v5009_v41 = vld [vmem:[#allocation17 + $0x44] ss:$24 sps:$4 sm:$0xff]   ;;  %v5004_v42 = vld [vmem:[#allocation17 + $0x338] ss:$24 sps:$4 sm:$0xff]  }
 0x479   :  { %3716 = vmatprep.subr.bf16.mxu0 %v4934_v43  ;;  %v5007_v43 = vld [vmem:[#allocation17 + $0x40] ss:$24 sps:$4 sm:$0xff]  }
 0x47b   :  { %3758 = vmatpush1.bf16.msra.mxu1 %v4935_v44  ;;  %v5012_v44 = vld [vmem:[#allocation17 + $0x36c] ss:$24 sps:$4 sm:$0xff]  }
 0x47c   :  { %3717 = vmatpush1.bf16.msra.mxu0 %v4932_v46  ;;  %3759 = vmatprep.subr.bf16.mxu1 %v4943_v47  ;;  %v5015_v46 = vld [vmem:[#allocation17 + $0x74] ss:$24 sps:$4 sm:$0xff]   ;;  %v5010_v47 = vld [vmem:[#allocation17 + $0x368] ss:$24 sps:$4 sm:$0xff]  }
 0x47d   :  { %3718 = vmatprep.subr.bf16.mxu0 %v4940_v48  ;;  %v5013_v48 = vld [vmem:[#allocation17 + $0x70] ss:$24 sps:$4 sm:$0xff]  }
 0x47f   :  { %3760 = vmatpush1.bf16.msra.mxu1 %v4941_v49  ;;  %v5018_v49 = vld [vmem:[#allocation17 + $0x39c] ss:$24 sps:$4 sm:$0xff]  }
 0x480   :  { %3719 = vmatpush1.bf16.msra.mxu0 %v4938_v50  ;;  %3761 = vmatprep.subr.bf16.mxu1 %v4949_v51  ;;  %v5021_v50 = vld [vmem:[#allocation17 + $0xa4] ss:$24 sps:$4 sm:$0xff]   ;;  %v5016_v51 = vld [vmem:[#allocation17 + $0x398] ss:$24 sps:$4 sm:$0xff]  }
 0x481   :  { %3720 = vmatprep.subr.bf16.mxu0 %v4946_v52  ;;  %v5019_v52 = vld [vmem:[#allocation17 + $0xa0] ss:$24 sps:$4 sm:$0xff]  }
 0x483   :  { %3762 = vmatpush1.bf16.msra.mxu1 %v4947_v53  ;;  %v5024_v53 = vld [vmem:[#allocation17 + $0x3cc] ss:$24 sps:$4 sm:$0xff]  }
 0x484   :  { %3721 = vmatpush1.bf16.msra.mxu0 %v4944_v54  ;;  %3763 = vmatprep.subr.bf16.mxu1 %v4955_v55  ;;  %v5027_v54 = vld [vmem:[#allocation17 + $0xd4] ss:$24 sps:$4 sm:$0xff]   ;;  %v5025_v55 = vld [vmem:[#allocation17 + $0xd0] ss:$24 sps:$4 sm:$0xff]  }
 0x485   :  { %3722 = vmatprep.subr.bf16.mxu0 %v4952_v56  ;;  %v5030_v56 = vld [vmem:[#allocation17 + $0x3fc] ss:$24 sps:$4 sm:$0xff]  }
 0x487   :  { %3764 = vmatpush1.bf16.msra.mxu1 %v4953_v57  ;;  %v5033_v57 = vld [vmem:[#allocation17 + $0x104] ss:$24 sps:$4 sm:$0xff]  }
 0x488   :  { %3723 = vmatpush1.bf16.msra.mxu0 %v4950_v58  ;;  %3765 = vmatprep.subr.bf16.mxu1 %v4961_v45  ;;  %v5028_v58 = vld [vmem:[#allocation17 + $0x3f8] ss:$24 sps:$4 sm:$0xff]  }
 0x489   :  { %3724 = vmatprep.subr.bf16.mxu0 %v4958_v61  ;;  %v5031_v45 = vld [vmem:[#allocation17 + $0x100] ss:$24 sps:$4 sm:$0xff]   ;;  %v5036_v61 = vld [vmem:[#allocation17 + $0x42c] ss:$24 sps:$4 sm:$0xff]  }
 0x48b   :  { %3766 = vmatpush1.bf16.msra.mxu1 %v4959_v62  ;;  %v5039_v62 = vld [vmem:[#allocation17 + $0x134] ss:$24 sps:$4 sm:$0xff]  }
 0x48c   :  { %3725 = vmatpush1.bf16.msra.mxu0 %v4956_v0  ;;  %3767 = vmatprep.subr.bf16.mxu1 %v4967_v60  ;;  %v5034_v0 = vld [vmem:[#allocation17 + $0x428] ss:$24 sps:$4 sm:$0xff]  }
 0x48d   :  { %3726 = vmatprep.subr.bf16.mxu0 %v4964_v1  ;;  %v5037_v60 = vld [vmem:[#allocation17 + $0x130] ss:$24 sps:$4 sm:$0xff]   ;;  %v5042_v1 = vld [vmem:[#allocation17 + $0x45c] ss:$24 sps:$4 sm:$0xff]  }
 0x48f   :  { %3768 = vmatpush1.bf16.msra.mxu1 %v4965_v2  ;;  %v5045_v2 = vld [vmem:[#allocation17 + $0x164] ss:$24 sps:$4 sm:$0xff]  }
 0x490   :  { %3727 = vmatpush1.bf16.msra.mxu0 %v4962_v3  ;;  %3769 = vmatprep.subr.bf16.mxu1 %v4973_v4  ;;  %v5040_v3 = vld [vmem:[#allocation17 + $0x458] ss:$24 sps:$4 sm:$0xff]  }
 0x491   :  { %3728 = vmatprep.subr.bf16.mxu0 %v4970_v5  ;;  %v5043_v4 = vld [vmem:[#allocation17 + $0x160] ss:$24 sps:$4 sm:$0xff]   ;;  %v5048_v5 = vld [vmem:[#allocation17 + $0x48c] ss:$24 sps:$4 sm:$0xff]  }
 0x493   :  { %3770 = vmatpush1.bf16.msra.mxu1 %v4971_v7  ;;  %v5051_v7 = vld [vmem:[#allocation17 + $0x194] ss:$24 sps:$4 sm:$0xff]  }
 0x494   :  { %3729 = vmatpush1.bf16.msra.mxu0 %v4968_v8  ;;  %3771 = vmatprep.subr.bf16.mxu1 %v4979_v9  ;;  %v5046_v8 = vld [vmem:[#allocation17 + $0x488] ss:$24 sps:$4 sm:$0xff]  }
 0x495   :  { %3730 = vmatprep.subr.bf16.mxu0 %v4976_v10  ;;  %v5049_v9 = vld [vmem:[#allocation17 + $0x190] ss:$24 sps:$4 sm:$0xff]   ;;  %v5054_v10 = vld [vmem:[#allocation17 + $0x4bc] ss:$24 sps:$4 sm:$0xff]  }
 0x497   :  { %3772 = vmatpush1.bf16.msra.mxu1 %v4977_v12  ;;  %v5057_v12 = vld [vmem:[#allocation17 + $0x1c4] ss:$24 sps:$4 sm:$0xff]  }
 0x498   :  { %3731 = vmatpush1.bf16.msra.mxu0 %v4974_v13  ;;  %3773 = vmatprep.subr.bf16.mxu1 %v4985_v16  ;;  %v5052_v13 = vld [vmem:[#allocation17 + $0x4b8] ss:$24 sps:$4 sm:$0xff]  }
 0x499   :  { %3732 = vmatprep.subr.bf16.mxu0 %v4982_v19  ;;  %v5055_v16 = vld [vmem:[#allocation17 + $0x1c0] ss:$24 sps:$4 sm:$0xff]   ;;  %v5060_v19 = vld [vmem:[#allocation17 + $0x4ec] ss:$24 sps:$4 sm:$0xff]  }
 0x49b   :  { %3774 = vmatpush1.bf16.msra.mxu1 %v4983_v21  ;;  %v5063_v21 = vld [vmem:[#allocation17 + $0x1f4] ss:$24 sps:$4 sm:$0xff]  }
 0x49c   :  { %3733 = vmatpush1.bf16.msra.mxu0 %v4980_v22  ;;  %3775 = vmatprep.subr.bf16.mxu1 %v4991_v23  ;;  %v5058_v22 = vld [vmem:[#allocation17 + $0x4e8] ss:$24 sps:$4 sm:$0xff]  }
 0x49d   :  { %3734 = vmatprep.subr.bf16.mxu0 %v4988_v24  ;;  %v5061_v23 = vld [vmem:[#allocation17 + $0x1f0] ss:$24 sps:$4 sm:$0xff]   ;;  %v5066_v24 = vld [vmem:[#allocation17 + $0x51c] ss:$24 sps:$4 sm:$0xff]  }
 0x49f   :  { %3776 = vmatpush1.bf16.msra.mxu1 %v4989_v25  ;;  %v5069_v25 = vld [vmem:[#allocation17 + $0x224] ss:$24 sps:$4 sm:$0xff]  }
 0x4a0   :  { %3735 = vmatpush1.bf16.msra.mxu0 %v4986_v26  ;;  %3777 = vmatprep.subr.bf16.mxu1 %v4997_v27  ;;  %v5064_v26 = vld [vmem:[#allocation17 + $0x518] ss:$24 sps:$4 sm:$0xff]  }
 0x4a1   :  { %3736 = vmatprep.subr.bf16.mxu0 %v4994_v29  ;;  %v5067_v27 = vld [vmem:[#allocation17 + $0x220] ss:$24 sps:$4 sm:$0xff]   ;;  %v5072_v29 = vld [vmem:[#allocation17 + $0x54c] ss:$24 sps:$4 sm:$0xff]  }
 0x4a3   :  { %3778 = vmatpush1.bf16.msra.mxu1 %v4995_v30  ;;  %v5075_v30 = vld [vmem:[#allocation17 + $0x254] ss:$24 sps:$4 sm:$0xff]  }
 0x4a4   :  { %3737 = vmatpush1.bf16.msra.mxu0 %v4992_v31  ;;  %3788 = vmatprep.subr.bf16.mxu1 %v5000_v6  ;;  %v5070_v31 = vld [vmem:[#allocation17 + $0x548] ss:$24 sps:$4 sm:$0xff]  }
 0x4a5   :  { %3870 = vmatprep.subr.bf16.mxu0 %v5003_v32  ;;  %v5073_v6 = vld [vmem:[#allocation17 + $0x250] ss:$24 sps:$4 sm:$0xff]   ;;  %v5078_v32 = vld [vmem:[#allocation17 + $0x57c] ss:$24 sps:$4 sm:$0xff]  }
 0x4a6   :  { %3780 = vmatmul.mubr.bf16.vlgmr.msra.gmra.mrb[36].mxu1 %v6125_v17 }
 0x4a7   :  { %3739 = vmatmul.mubr.bf16.vlgmr.msra.gmra.mrb[20].mxu0 %v6140_v36  ;;  %3789 = vmatpush1.bf16.msra.mxu1 %v4998_v34  ;;  %v5076_v34 = vld [vmem:[#allocation17 + $0x578] ss:$24 sps:$4 sm:$0xff]  }
 0x4a8   :  { %3820 = vmatprep.mubr.bf16.mxu1 %v6127_v18  ;;  %3871 = vmatpush1.bf16.msra.mxu0 %v5001_v35  ;;  %v5079_v35 = vld [vmem:[#allocation17 + $0x280] ss:$24 sps:$4 sm:$0xff]  }
 0x4a9   :  { %3902 = vmatprep.mubr.bf16.mxu0 %v6123_v15  ;;  %3790 = vmatprep.subr.bf16.mxu1 %v5006_v39  ;;  %v5022_v15 = vld [vmem:[#allocation17 + $0x3c8] ss:$24 sps:$4 sm:$0xff]   ;;  %v5084_v39 = vld [vmem:[#allocation17 + $0x5ac] ss:$24 sps:$4 sm:$0xff]  }
 0x4aa   :  { %3872 = vmatprep.subr.bf16.mxu0 %v5009_v41  ;;  %v5087_v41 = vld [vmem:[#allocation17 + $0x2b4] ss:$24 sps:$4 sm:$0xff]  }
 0x4ab   :  { %3791 = vmatpush1.bf16.msra.mxu1 %v5004_v42  ;;  %v5082_v42 = vld [vmem:[#allocation17 + $0x5a8] ss:$24 sps:$4 sm:$0xff]  }
 0x4ac   :  { %3873 = vmatpush1.bf16.msra.mxu0 %v5007_v43  ;;  %3792 = vmatprep.subr.bf16.mxu1 %v5012_v44  ;;  %v5085_v43 = vld [vmem:[#allocation17 + $0x2b0] ss:$24 sps:$4 sm:$0xff]   ;;  %v5090_v44 = vld [vmem:[#allocation17 + $0x5dc] ss:$24 sps:$4 sm:$0xff]  }
 0x4ad   :  { %3874 = vmatprep.subr.bf16.mxu0 %v5015_v46  ;;  %v5093_v46 = vld [vmem:[#allocation17 + $0x2e4] ss:$24 sps:$4 sm:$0xff]  }
 0x4af   :  { %3793 = vmatpush1.bf16.msra.mxu1 %v5010_v47  ;;  %v5088_v47 = vld [vmem:[#allocation17 + $0x5d8] ss:$24 sps:$4 sm:$0xff]  }
 0x4b0   :  { %3875 = vmatpush1.bf16.msra.mxu0 %v5013_v48  ;;  %3794 = vmatprep.subr.bf16.mxu1 %v5018_v49  ;;  %v5091_v48 = vld [vmem:[#allocation17 + $0x2e0] ss:$24 sps:$4 sm:$0xff]   ;;  %v5096_v49 = vld [vmem:[#allocation17 + $0x60c] ss:$24 sps:$4 sm:$0xff]  }
 0x4b1   :  { %3876 = vmatprep.subr.bf16.mxu0 %v5021_v50  ;;  %v5099_v50 = vld [vmem:[#allocation17 + $0x314] ss:$24 sps:$4 sm:$0xff]  }
 0x4b3   :  { %3795 = vmatpush1.bf16.msra.mxu1 %v5016_v51  ;;  %v5094_v51 = vld [vmem:[#allocation17 + $0x608] ss:$24 sps:$4 sm:$0xff]  }
 0x4b4   :  { %3877 = vmatpush1.bf16.msra.mxu0 %v5019_v52  ;;  %3796 = vmatprep.subr.bf16.mxu1 %v5024_v53  ;;  %v5097_v52 = vld [vmem:[#allocation17 + $0x310] ss:$24 sps:$4 sm:$0xff]   ;;  %v5102_v53 = vld [vmem:[#allocation17 + $0x63c] ss:$24 sps:$4 sm:$0xff]  }
 0x4b5   :  { %3878 = vmatprep.subr.bf16.mxu0 %v5027_v54  ;;  %v5105_v54 = vld [vmem:[#allocation17 + $0x344] ss:$24 sps:$4 sm:$0xff]  }
 0x4b7   :  { %3797 = vmatpush1.bf16.msra.mxu1 %v5022_v15  ;;  %v5100_v15 = vld [vmem:[#allocation17 + $0x638] ss:$24 sps:$4 sm:$0xff]  }
 0x4b8   :  { %3879 = vmatpush1.bf16.msra.mxu0 %v5025_v55  ;;  %3798 = vmatprep.subr.bf16.mxu1 %v5030_v56  ;;  %v5103_v55 = vld [vmem:[#allocation17 + $0x340] ss:$24 sps:$4 sm:$0xff]   ;;  %v5108_v56 = vld [vmem:[#allocation17 + $0x66c] ss:$24 sps:$4 sm:$0xff]  }
 0x4b9   :  { %3880 = vmatprep.subr.bf16.mxu0 %v5033_v57  ;;  %v5111_v57 = vld [vmem:[#allocation17 + $0x374] ss:$24 sps:$4 sm:$0xff]  }
 0x4bb   :  { %3799 = vmatpush1.bf16.msra.mxu1 %v5028_v58  ;;  %v5106_v58 = vld [vmem:[#allocation17 + $0x668] ss:$24 sps:$4 sm:$0xff]  }
 0x4bc   :  { %3881 = vmatpush1.bf16.msra.mxu0 %v5031_v45  ;;  %3800 = vmatprep.subr.bf16.mxu1 %v5036_v61  ;;  %v5109_v45 = vld [vmem:[#allocation17 + $0x370] ss:$24 sps:$4 sm:$0xff]   ;;  %v5114_v61 = vld [vmem:[#allocation17 + $0x69c] ss:$24 sps:$4 sm:$0xff]  }
 0x4bd   :  { %3882 = vmatprep.subr.bf16.mxu0 %v5039_v62  ;;  %v5112_v62 = vld [vmem:[#allocation17 + $0x698] ss:$24 sps:$4 sm:$0xff]  }
 0x4bf   :  { %3801 = vmatpush1.bf16.msra.mxu1 %v5034_v0  ;;  %v5115_v0 = vld [vmem:[#allocation17 + $0x3a0] ss:$24 sps:$4 sm:$0xff]  }
 0x4c0   :  { %3883 = vmatpush1.bf16.msra.mxu0 %v5037_v60  ;;  %3802 = vmatprep.subr.bf16.mxu1 %v5042_v1  ;;  %v5120_v60 = vld [vmem:[#allocation17 + $0x6cc] ss:$24 sps:$4 sm:$0xff]  }
 0x4c1   :  { %3884 = vmatprep.subr.bf16.mxu0 %v5045_v2  ;;  %v5123_v1 = vld [vmem:[#allocation17 + $0x3d4] ss:$24 sps:$4 sm:$0xff]   ;;  %v5121_v2 = vld [vmem:[#allocation17 + $0x3d0] ss:$24 sps:$4 sm:$0xff]  }
 0x4c3   :  { %3803 = vmatpush1.bf16.msra.mxu1 %v5040_v3  ;;  %v5126_v3 = vld [vmem:[#allocation17 + $0x6fc] ss:$24 sps:$4 sm:$0xff]  }
 0x4c4   :  { %3885 = vmatpush1.bf16.msra.mxu0 %v5043_v4  ;;  %3804 = vmatprep.subr.bf16.mxu1 %v5048_v5  ;;  %v5129_v4 = vld [vmem:[#allocation17 + $0x404] ss:$24 sps:$4 sm:$0xff]   ;;  %v5124_v5 = vld [vmem:[#allocation17 + $0x6f8] ss:$24 sps:$4 sm:$0xff]  }
 0x4c5   :  { %3886 = vmatprep.subr.bf16.mxu0 %v5051_v7  ;;  %v5127_v7 = vld [vmem:[#allocation17 + $0x400] ss:$24 sps:$4 sm:$0xff]  }
 0x4c7   :  { %3805 = vmatpush1.bf16.msra.mxu1 %v5046_v8  ;;  %v5132_v8 = vld [vmem:[#allocation17 + $0x72c] ss:$24 sps:$4 sm:$0xff]  }
 0x4c8   :  { %3887 = vmatpush1.bf16.msra.mxu0 %v5049_v9  ;;  %3806 = vmatprep.subr.bf16.mxu1 %v5054_v10  ;;  %v5135_v9 = vld [vmem:[#allocation17 + $0x434] ss:$24 sps:$4 sm:$0xff]   ;;  %v5130_v10 = vld [vmem:[#allocation17 + $0x728] ss:$24 sps:$4 sm:$0xff]  }
 0x4c9   :  { %3888 = vmatprep.subr.bf16.mxu0 %v5057_v12  ;;  %v5133_v12 = vld [vmem:[#allocation17 + $0x430] ss:$24 sps:$4 sm:$0xff]  }
 0x4cb   :  { %3807 = vmatpush1.bf16.msra.mxu1 %v5052_v13  ;;  %v5138_v13 = vld [vmem:[#allocation17 + $0x75c] ss:$24 sps:$4 sm:$0xff]  }
 0x4cc   :  { %3889 = vmatpush1.bf16.msra.mxu0 %v5055_v16  ;;  %3808 = vmatprep.subr.bf16.mxu1 %v5060_v19  ;;  %v5141_v16 = vld [vmem:[#allocation17 + $0x464] ss:$24 sps:$4 sm:$0xff]   ;;  %v5136_v19 = vld [vmem:[#allocation17 + $0x758] ss:$24 sps:$4 sm:$0xff]  }
 0x4cd   :  { %3890 = vmatprep.subr.bf16.mxu0 %v5063_v21  ;;  %v5139_v21 = vld [vmem:[#allocation17 + $0x460] ss:$24 sps:$4 sm:$0xff]  }
 0x4cf   :  { %3809 = vmatpush1.bf16.msra.mxu1 %v5058_v22  ;;  %v5144_v22 = vld [vmem:[#allocation17 + $0x78c] ss:$24 sps:$4 sm:$0xff]  }
 0x4d0   :  { %3891 = vmatpush1.bf16.msra.mxu0 %v5061_v23  ;;  %3810 = vmatprep.subr.bf16.mxu1 %v5066_v24  ;;  %v5147_v23 = vld [vmem:[#allocation17 + $0x494] ss:$24 sps:$4 sm:$0xff]   ;;  %v5142_v24 = vld [vmem:[#allocation17 + $0x788] ss:$24 sps:$4 sm:$0xff]  }
 0x4d1   :  { %3892 = vmatprep.subr.bf16.mxu0 %v5069_v25  ;;  %v5145_v25 = vld [vmem:[#allocation17 + $0x490] ss:$24 sps:$4 sm:$0xff]  }
 0x4d3   :  { %3811 = vmatpush1.bf16.msra.mxu1 %v5064_v26  ;;  %v5150_v26 = vld [vmem:[#allocation17 + $0x7bc] ss:$24 sps:$4 sm:$0xff]  }
 0x4d4   :  { %3893 = vmatpush1.bf16.msra.mxu0 %v5067_v27  ;;  %3812 = vmatprep.subr.bf16.mxu1 %v5072_v29  ;;  %v5153_v27 = vld [vmem:[#allocation17 + $0x4c4] ss:$24 sps:$4 sm:$0xff]   ;;  %v5148_v29 = vld [vmem:[#allocation17 + $0x7b8] ss:$24 sps:$4 sm:$0xff]  }
 0x4d5   :  { %3894 = vmatprep.subr.bf16.mxu0 %v5075_v30  ;;  %v5151_v30 = vld [vmem:[#allocation17 + $0x4c0] ss:$24 sps:$4 sm:$0xff]  }
 0x4d7   :  { %3813 = vmatpush1.bf16.msra.mxu1 %v5070_v31  ;;  %v5156_v31 = vld [vmem:[#allocation17 + $0x7ec] ss:$24 sps:$4 sm:$0xff]  }
 0x4d8   :  { %3895 = vmatpush1.bf16.msra.mxu0 %v5073_v6  ;;  %3814 = vmatprep.subr.bf16.mxu1 %v5078_v32  ;;  %v5159_v6 = vld [vmem:[#allocation17 + $0x4f4] ss:$24 sps:$4 sm:$0xff]   ;;  %v5154_v32 = vld [vmem:[#allocation17 + $0x7e8] ss:$24 sps:$4 sm:$0xff]  }
 0x4d9   :  { %3896 = vmatprep.subr.bf16.mxu0 %v5081_v33  ;;  %v5157_v33 = vld [vmem:[#allocation17 + $0x4f0] ss:$24 sps:$4 sm:$0xff]  }
 0x4db   :  { %3815 = vmatpush1.bf16.msra.mxu1 %v5076_v34  ;;  %v5162_v34 = vld [vmem:[#allocation17 + $0x81c] ss:$24 sps:$4 sm:$0xff]  }
 0x4dc   :  { %3897 = vmatpush1.bf16.msra.mxu0 %v5079_v35  ;;  %3816 = vmatprep.subr.bf16.mxu1 %v5084_v39  ;;  %v5165_v35 = vld [vmem:[#allocation17 + $0x524] ss:$24 sps:$4 sm:$0xff]   ;;  %v5160_v39 = vld [vmem:[#allocation17 + $0x818] ss:$24 sps:$4 sm:$0xff]  }
 0x4dd   :  { %3898 = vmatprep.subr.bf16.mxu0 %v5087_v41  ;;  %v5163_v41 = vld [vmem:[#allocation17 + $0x520] ss:$24 sps:$4 sm:$0xff]  }
 0x4df   :  { %3817 = vmatpush1.bf16.msra.mxu1 %v5082_v42  ;;  %v5168_v42 = vld [vmem:[#allocation17 + $0x84c] ss:$24 sps:$4 sm:$0xff]  }
 0x4e0   :  { %3899 = vmatpush1.bf16.msra.mxu0 %v5085_v43  ;;  %3818 = vmatprep.subr.bf16.mxu1 %v5090_v44  ;;  %v5171_v43 = vld [vmem:[#allocation17 + $0x554] ss:$24 sps:$4 sm:$0xff]   ;;  %v5166_v44 = vld [vmem:[#allocation17 + $0x848] ss:$24 sps:$4 sm:$0xff]  }
 0x4e1   :  { %3900 = vmatprep.subr.bf16.mxu0 %v5093_v46  ;;  %v5169_v46 = vld [vmem:[#allocation17 + $0x550] ss:$24 sps:$4 sm:$0xff]  }
 0x4e3   :  { %3819 = vmatpush1.bf16.msra.mxu1 %v5088_v47  ;;  %v5174_v47 = vld [vmem:[#allocation17 + $0x87c] ss:$24 sps:$4 sm:$0xff]  }
 0x4e4   :  { %3901 = vmatpush1.bf16.msra.mxu0 %v5091_v48  ;;  %3829 = vmatprep.subr.bf16.mxu1 %v5096_v49  ;;  %v5177_v48 = vld [vmem:[#allocation17 + $0x584] ss:$24 sps:$4 sm:$0xff]   ;;  %v5172_v49 = vld [vmem:[#allocation17 + $0x878] ss:$24 sps:$4 sm:$0xff]  }
 0x4e5   :  { %3911 = vmatprep.subr.bf16.mxu0 %v5099_v50  ;;  %v5175_v50 = vld [vmem:[#allocation17 + $0x580] ss:$24 sps:$4 sm:$0xff]  }
 0x4e6   :  { %3821 = vmatmul.mubr.bf16.vlgmr.msra.gmra.mrb[36].mxu1 %v6129_v20 }
 0x4e7   :  { %3903 = vmatmul.mubr.bf16.vlgmr.msra.gmra.mrb[24].mxu0 %v6125_v17  ;;  %3830 = vmatpush1.bf16.msra.mxu1 %v5094_v51  ;;  %v5117_v17 = vld [vmem:[#allocation17 + $0x3a4] ss:$24 sps:$4 sm:$0xff]  }
 0x4e8   :  { %3861 = vmatprep.mubr.bf16.mxu1 %v6136_v28  ;;  %3912 = vmatpush1.bf16.msra.mxu0 %v5097_v52  ;;  %v5180_v51 = vld [vmem:[#allocation17 + $0x8ac] ss:$24 sps:$4 sm:$0xff]  }
 0x4e9   :  { %3943 = vmatprep.mubr.bf16.mxu0 %v6127_v18  ;;  %3831 = vmatprep.subr.bf16.mxu1 %v5102_v53  ;;  %v5118_v18 = vld [vmem:[#allocation17 + $0x6c8] ss:$24 sps:$4 sm:$0xff]   ;;  %v5183_v52 = vld [vmem:[#allocation17 + $0x5b4] ss:$24 sps:$4 sm:$0xff]  }
 0x4ea   :  { %3913 = vmatprep.subr.bf16.mxu0 %v5105_v54  ;;  %v5178_v53 = vld [vmem:[#allocation17 + $0x8a8] ss:$24 sps:$4 sm:$0xff]  }
 0x4eb   :  { %3832 = vmatpush1.bf16.msra.mxu1 %v5100_v15  ;;  %v5181_v54 = vld [vmem:[#allocation17 + $0x5b0] ss:$24 sps:$4 sm:$0xff]   ;;  %v5186_v15 = vld [vmem:[#allocation17 + $0x8dc] ss:$24 sps:$4 sm:$0xff]  }
 0x4ec   :  { %3914 = vmatpush1.bf16.msra.mxu0 %v5103_v55  ;;  %3833 = vmatprep.subr.bf16.mxu1 %v5108_v56  ;;  %v5189_v55 = vld [vmem:[#allocation17 + $0x5e4] ss:$24 sps:$4 sm:$0xff]   ;;  %v5184_v56 = vld [vmem:[#allocation17 + $0x8d8] ss:$24 sps:$4 sm:$0xff]  }
 0x4ed   :  { %3915 = vmatprep.subr.bf16.mxu0 %v5111_v57  ;;  %v5187_v57 = vld [vmem:[#allocation17 + $0x5e0] ss:$24 sps:$4 sm:$0xff]  }
 0x4ef   :  { %3834 = vmatpush1.bf16.msra.mxu1 %v5106_v58  ;;  %v5192_v58 = vld [vmem:[#allocation17 + $0x614] ss:$24 sps:$4 sm:$0xff]  }
 0x4f0   :  { %3916 = vmatpush1.bf16.msra.mxu0 %v5109_v45  ;;  %3835 = vmatprep.subr.bf16.mxu1 %v5114_v61  ;;  %v5190_v45 = vld [vmem:[#allocation17 + $0x610] ss:$24 sps:$4 sm:$0xff]   ;;  %v5195_v61 = vld [vmem:[#allocation17 + $0x644] ss:$24 sps:$4 sm:$0xff]  }
 0x4f1   :  { %3917 = vmatprep.subr.bf16.mxu0 %v5117_v17  ;;  %v5193_v17 = vld [vmem:[#allocation17 + $0x640] ss:$24 sps:$4 sm:$0xff]  }
 0x4f3   :  { %3836 = vmatpush1.bf16.msra.mxu1 %v5112_v62  ;;  %v5198_v62 = vld [vmem:[#allocation17 + $0x674] ss:$24 sps:$4 sm:$0xff]  }
 0x4f4   :  { %3918 = vmatpush1.bf16.msra.mxu0 %v5115_v0  ;;  %3837 = vmatprep.subr.bf16.mxu1 %v5120_v60  ;;  %v5196_v0 = vld [vmem:[#allocation17 + $0x670] ss:$24 sps:$4 sm:$0xff]   ;;  %v5201_v60 = vld [vmem:[#allocation17 + $0x6a4] ss:$24 sps:$4 sm:$0xff]  }
 0x4f5   :  { %3919 = vmatprep.subr.bf16.mxu0 %v5123_v1  ;;  %v5199_v1 = vld [vmem:[#allocation17 + $0x6a0] ss:$24 sps:$4 sm:$0xff]  }
 0x4f7   :  { %3838 = vmatpush1.bf16.msra.mxu1 %v5118_v18  ;;  %v5204_v18 = vld [vmem:[#allocation17 + $0x6d4] ss:$24 sps:$4 sm:$0xff]  }
 0x4f8   :  { %3920 = vmatpush1.bf16.msra.mxu0 %v5121_v2  ;;  %3839 = vmatprep.subr.bf16.mxu1 %v5126_v3  ;;  %v5202_v2 = vld [vmem:[#allocation17 + $0x6d0] ss:$24 sps:$4 sm:$0xff]   ;;  %v5207_v3 = vld [vmem:[#allocation17 + $0x704] ss:$24 sps:$4 sm:$0xff]  }
 0x4f9   :  { %3921 = vmatprep.subr.bf16.mxu0 %v5129_v4 }
 0x4fb   :  { %3840 = vmatpush1.bf16.msra.mxu1 %v5124_v5 }
 0x4fc   :  { %3922 = vmatpush1.bf16.msra.mxu0 %v5127_v7  ;;  %3841 = vmatprep.subr.bf16.mxu1 %v5132_v8 }
 0x4fd   :  { %3923 = vmatprep.subr.bf16.mxu0 %v5135_v9  ;;  %v5208_v9 = vld [vmem:[#allocation17 + $0x730] ss:$24 sps:$4 sm:$0xff]  }
 0x4ff   :  { %3842 = vmatpush1.bf16.msra.mxu1 %v5130_v10  ;;  %v5213_v10 = vld [vmem:[#allocation17 + $0x764] ss:$24 sps:$4 sm:$0xff]  }
 0x500   :  { %3924 = vmatpush1.bf16.msra.mxu0 %v5133_v12  ;;  %3843 = vmatprep.subr.bf16.mxu1 %v5138_v13  ;;  %v5211_v12 = vld [vmem:[#allocation17 + $0x760] ss:$24 sps:$4 sm:$0xff]   ;;  %v5216_v13 = vld [vmem:[#allocation17 + $0x794] ss:$24 sps:$4 sm:$0xff]  }
 0x501   :  { %3925 = vmatprep.subr.bf16.mxu0 %v5141_v16  ;;  %v5214_v16 = vld [vmem:[#allocation17 + $0x790] ss:$24 sps:$4 sm:$0xff]  }
 0x503   :  { %3844 = vmatpush1.bf16.msra.mxu1 %v5136_v19  ;;  %v5219_v19 = vld [vmem:[#allocation17 + $0x7c4] ss:$24 sps:$4 sm:$0xff]  }
 0x504   :  { %3926 = vmatpush1.bf16.msra.mxu0 %v5139_v21  ;;  %3845 = vmatprep.subr.bf16.mxu1 %v5144_v22  ;;  %v5217_v21 = vld [vmem:[#allocation17 + $0x7c0] ss:$24 sps:$4 sm:$0xff]   ;;  %v5222_v22 = vld [vmem:[#allocation17 + $0x7f4] ss:$24 sps:$4 sm:$0xff]  }
 0x505   :  { %3927 = vmatprep.subr.bf16.mxu0 %v5147_v23  ;;  %v5220_v23 = vld [vmem:[#allocation17 + $0x7f0] ss:$24 sps:$4 sm:$0xff]  }
 0x507   :  { %3846 = vmatpush1.bf16.msra.mxu1 %v5142_v24  ;;  %v5225_v24 = vld [vmem:[#allocation17 + $0x824] ss:$24 sps:$4 sm:$0xff]  }
 0x508   :  { %3928 = vmatpush1.bf16.msra.mxu0 %v5145_v25  ;;  %3847 = vmatprep.subr.bf16.mxu1 %v5150_v26  ;;  %v5223_v25 = vld [vmem:[#allocation17 + $0x820] ss:$24 sps:$4 sm:$0xff]   ;;  %v5228_v26 = vld [vmem:[#allocation17 + $0x854] ss:$24 sps:$4 sm:$0xff]  }
 0x509   :  { %3929 = vmatprep.subr.bf16.mxu0 %v5153_v27  ;;  %v5226_v27 = vld [vmem:[#allocation17 + $0x850] ss:$24 sps:$4 sm:$0xff]  }
 0x50b   :  { %3848 = vmatpush1.bf16.msra.mxu1 %v5148_v29  ;;  %v5231_v29 = vld [vmem:[#allocation17 + $0x884] ss:$24 sps:$4 sm:$0xff]  }
 0x50c   :  { %3930 = vmatpush1.bf16.msra.mxu0 %v5151_v30  ;;  %3849 = vmatprep.subr.bf16.mxu1 %v5156_v31  ;;  %v5229_v30 = vld [vmem:[#allocation17 + $0x880] ss:$24 sps:$4 sm:$0xff]   ;;  %v5234_v31 = vld [vmem:[#allocation17 + $0x8b4] ss:$24 sps:$4 sm:$0xff]  }
 0x50d   :  { %3931 = vmatprep.subr.bf16.mxu0 %v5159_v6  ;;  %v5232_v6 = vld [vmem:[#allocation17 + $0x8b0] ss:$24 sps:$4 sm:$0xff]  }
 0x50f   :  { %3850 = vmatpush1.bf16.msra.mxu1 %v5154_v32  ;;  %v5237_v32 = vld [vmem:[#allocation17 + $0x8e4] ss:$24 sps:$4 sm:$0xff]  }
 0x510   :  { %3932 = vmatpush1.bf16.msra.mxu0 %v5157_v33  ;;  %3851 = vmatprep.subr.bf16.mxu1 %v5162_v34  ;;  %v5235_v33 = vld [vmem:[#allocation17 + $0x8e0] ss:$24 sps:$4 sm:$0xff]  }
 0x511   :  { %3933 = vmatprep.subr.bf16.mxu0 %v5165_v35  ;;  %v2152_v34 = vld [vmem:[#allocation19] sm:$0x3f] }
 0x512   :  { %v2157_v35 = vrot.slane %v2152_v34, %v1818_v37  ;;  %v2169_v37 = vrot.slane %v2152_v34, %v1830_v14 }
 0x513   :  { %3852 = vmatpush1.bf16.msra.mxu1 %v5160_v39  ;;  %v2161_v39 = vrot.slane %v2152_v34, %v1822_v40 }
 0x514   :  { %3934 = vmatpush1.bf16.msra.mxu0 %v5163_v41  ;;  %3853 = vmatprep.subr.bf16.mxu1 %v5168_v42 }
 0x515   :  { %3935 = vmatprep.subr.bf16.mxu0 %v5171_v43 }
 0x517   :  { %3854 = vmatpush1.bf16.msra.mxu1 %v5166_v44 }
 0x518   :  { %3936 = vmatpush1.bf16.msra.mxu0 %v5169_v46  ;;  %3855 = vmatprep.subr.bf16.mxu1 %v5174_v47 }
 0x519   :  { %3937 = vmatprep.subr.bf16.mxu0 %v5177_v48 }
 0x51b   :  { %3856 = vmatpush1.bf16.msra.mxu1 %v5172_v49 }
 0x51c   :  { %3938 = vmatpush1.bf16.msra.mxu0 %v5175_v50  ;;  %3857 = vmatprep.subr.bf16.mxu1 %v5180_v51  ;;  %v5549_v51 = vmov 1983009808  }
 0x51d   :  { %3939 = vmatprep.subr.bf16.mxu0 %v5183_v52  ;;  %v4002_v52 = vunpack.c.l.s4 %v5549_v51 }
 0x51f   :  { %3858 = vmatpush1.bf16.msra.mxu1 %v5178_v53  ;;  %v4003_v53 = vunpack.c.0.s8 %v4002_v52 }
 0x520   :  { %3940 = vmatpush1.bf16.msra.mxu0 %v5181_v54  ;;  %3859 = vmatprep.subr.bf16.mxu1 %v5186_v15 }
 0x521   :  { %3941 = vmatprep.subr.bf16.mxu0 %v5189_v55  ;;  %v4006_v55 = vsub.s32 %v4003_v53, %v5778_v11 }
 0x523   :  { %3860 = vmatpush1.bf16.msra.mxu1 %v5184_v56 }
 0x524   :  { %3942 = vmatpush1.bf16.msra.mxu0 %v5187_v57 }
 0x525   :  { %3952 = vmatprep.subr.bf16.mxu0 %v5192_v58 }
 0x526   :  { %3862 = vmatmul.mubr.bf16.vlgmr.msra.gmra.mrb[36].mxu1 %v6140_v36 }
 0x527   :  { %3944 = vmatmul.mubr.bf16.vlgmr.msra.gmra.mrb[24].mxu0 %v6129_v20  ;;  %v5205_v20 = vld [vmem:[#allocation17 + $0x700] ss:$24 sps:$4 sm:$0xff]  }
 0x528   :  { %3953 = vmatpush1.bf16.msra.mxu0 %v5190_v45  ;;  %3984 = vmatprep.mubr.bf16.mxu0 %v6136_v28  ;;  %v5210_v28 = vld [vmem:[#allocation17 + $0x734] ss:$24 sps:$4 sm:$0xff]  }
 0x529   :  { %3954 = vmatprep.subr.bf16.mxu0 %v5195_v61 }
 0x52c   :  { %3955 = vmatpush1.bf16.msra.mxu0 %v5193_v17 }
 0x52d   :  { %3956 = vmatprep.subr.bf16.mxu0 %v5198_v62 }
 0x530   :  { %3957 = vmatpush1.bf16.msra.mxu0 %v5196_v0  ;;  %v2177_v0 = vrot.slane %v2152_v34, %v1838_v63 }
 0x531   :  { %3958 = vmatprep.subr.bf16.mxu0 %v5201_v60 }
 0x534   :  { %3959 = vmatpush1.bf16.msra.mxu0 %v5199_v1 }
 0x535   :  { %3960 = vmatprep.subr.bf16.mxu0 %v5204_v18 }
 0x538   :  { %3961 = vmatpush1.bf16.msra.mxu0 %v5202_v2 }
 0x539   :  { %v3658_v4 = vpop.f32.mrb[32].mxu1  ;;  %3962 = vmatprep.subr.bf16.mxu0 %v5207_v3 }
 0x53a   :  { %v3660_v5 = vpop.f32.mrb[33].mxu1  ;;  %v3659_v41 = vadd.f32 %v3658_v4, %v2157_v35 }
 0x53b   :  { %v3662_v7 = vpop.f32.mrb[34].mxu1  ;;  %v3661_v42 = vadd.f32 %v3660_v5, %v2161_v39 }
 0x53c   :  { %3963 = vmatpush1.bf16.msra.mxu0 %v5205_v20  ;;  %v3663_v8 = vpop.f32.mrb[35].mxu1 }
 0x53d   :  { %3964 = vmatprep.subr.bf16.mxu0 %v5210_v28 }
 0x540   :  { %3965 = vmatpush1.bf16.msra.mxu0 %v5208_v9 }
 0x541   :  { %3966 = vmatprep.subr.bf16.mxu0 %v5213_v10 }
 0x544   :  { %3967 = vmatpush1.bf16.msra.mxu0 %v5211_v12 }
 0x545   :  { %3968 = vmatprep.subr.bf16.mxu0 %v5216_v13 }
 0x548   :  { %3969 = vmatpush1.bf16.msra.mxu0 %v5214_v16 }
 0x549   :  { %3970 = vmatprep.subr.bf16.mxu0 %v5219_v19 }
 0x54c   :  { %3971 = vmatpush1.bf16.msra.mxu0 %v5217_v21 }
 0x54d   :  { %3972 = vmatprep.subr.bf16.mxu0 %v5222_v22 }
 0x550   :  { %3973 = vmatpush1.bf16.msra.mxu0 %v5220_v23 }
 0x551   :  { %3974 = vmatprep.subr.bf16.mxu0 %v5225_v24 }
 0x554   :  { %3975 = vmatpush1.bf16.msra.mxu0 %v5223_v25 }
 0x555   :  { %3976 = vmatprep.subr.bf16.mxu0 %v5228_v26 }
 0x558   :  { %3977 = vmatpush1.bf16.msra.mxu0 %v5226_v27 }
 0x559   :  { %3978 = vmatprep.subr.bf16.mxu0 %v5231_v29 }
 0x55c   :  { %3979 = vmatpush1.bf16.msra.mxu0 %v5229_v30 }
 0x55d   :  { %3980 = vmatprep.subr.bf16.mxu0 %v5234_v31 }
 0x560   :  { %3981 = vmatpush1.bf16.msra.mxu0 %v5232_v6 }
 0x561   :  { %3982 = vmatprep.subr.bf16.mxu0 %v5237_v32 }
 0x564   :  { %3983 = vmatpush1.bf16.msra.mxu0 %v5235_v33 }
 0x567   :  { %3985 = vmatmul.mubr.bf16.vlgmr.msra.gmra.mrb[24].mxu0 %v6140_v36  ;;  %v2165_v36 = vrot.slane %v2152_v34, %v1826_v38  ;;  %v2173_v38 = vrot.slane %v2152_v34, %v1834_v59 }
 0x57a   :  { %v3740_v43 = vpop.f32.mrb[20].mxu0 }
 0x57b   :  { %v4619_v44 = vadd.f32 %v3740_v43, %v3659_v41  ;;  %v3742_v46 = vpop.f32.mrb[21].mxu0 }
 0x57c   :  { %v4621_v47 = vadd.f32 %v3742_v46, %v3661_v42  ;;  %v3744_v48 = vpop.f32.mrb[22].mxu0 }
 0x57d   :  { %v3745_v49 = vpop.f32.mrb[23].mxu0 }
 0x57e   :  { %v3999_v50 = vcombine.low %v4619_v44, %v4621_v47 }
 0x580   :  { %v4007_v61 = vrot.slane %v3999_v50, %v4006_v55 }
 0x5f9   :  { %v3863_v54 = vpop.f32.mrb[36].mxu1 }
 0x5fa   :  { %v4622_v40 = vadd.f32 %v3863_v54, %v2165_v36  ;;  %v3865_v15 = vpop.f32.mrb[37].mxu1 }
 0x5fb   :  { %v4623_v56 = vadd.f32 %v3865_v15, %v2169_v37  ;;  %v3867_v57 = vpop.f32.mrb[38].mxu1 }
 0x5fc   :  { %v3868_v58 = vpop.f32.mrb[39].mxu1 }
 0x5fd   :  { %v4000_v45 = vcombine.low %v4622_v40, %v4623_v56 }
 0x5ff   :  { %v4014_v17 = vrot.slane %v4000_v45, %v4006_v55 }
 0x601   :  { %v4015_v62 = vcombine.low %v4007_v61, %v4014_v17 }
 0x603   :  { %4026 = vst [vmem:[#allocation20] sm:$0xff] %v4015_v62 }
 0x63a   :  { %v3986_v14 = vpop.f32.mrb[24].mxu0 }
 0x63b   :  { %v4624_v60 = vadd.f32 %v3986_v14, %v2173_v38  ;;  %v3988_v1 = vpop.f32.mrb[25].mxu0 }
 0x63c   :  { %v4625_v18 = vadd.f32 %v3988_v1, %v2177_v0  ;;  %v3990_v2 = vpop.f32.mrb[26].mxu0 }
 0x63d   :  { %v3991_v3 = vpop.f32.mrb[27].mxu0 }
 0x63e   :  { %v4016_v20 = vcombine.low %v4624_v60, %v4625_v18 }
 0x640   :  { %4468 = vst.sshfl [vmem:[#allocation20 + $0x8] sm:$0x33 pattern:$0x76325410] %v4016_v20 }
 0x641   :  { %5503 = shalt.err (!%p5500_p8)
}
 0x642   :  { %s5504_s13 = scalar_lea.hbm %s6191_s12, 192 }
 0x643   :  { %p5505_p9 = scmp.ne.s32.totalorder %s6191_s12, %s5504_s13  ;;  %p5508_p10 = scmp.lt.u32.totalorder %s5504_s13, %s6191_s12 }
 0x645   :  { %p5510_p11 = pnand %p5508_p10, %p5505_p9 }
 0x647   :  { %5513 = shalt.err (!%p5510_p11)
}
 0x648   :  { %4037 = dma.vmem_to_hbm [thread:$0]  %s4035_s28, 192, %s6191_s12, [#allocation4]  }
 0x649   :  { %5526 = dma.done.wait [#allocation4], 192  }
 0x64a   :  { %5527 = vsyncadd [#allocation4], 4294967104 }
 0x64b   :  { %4041 = vsyncpa [#allocation3], 1 }
 0x64c   :  { %4042 = vsyncpa [#allocation6], 1 }
 0x64d   :  { %4043 = vsyncpa [#allocation9], 1 }
 0x64e   :  { %4044 = vsyncpa [#allocation12], 1 }
 0x64f   :  { %4045 = vsyncpa [#allocation15], 1 }
 0x650   :  { %4046 = vsyncpa [#allocation18], 1 }
 0x651   :  { %4047 = vsyncpa [#allocation4], 1 }

</bundles_post_ra>
